<compile_context>
chip_gen: v6e
topology: v6e:2x2x1
jax: 0.10.0
libtpu: 0.0.40
codegen_flags: <defaults>
</compile_context>

<pallas_src>
import functools

import jax
import jax.numpy as jnp
from jax.experimental import pallas as pl
from jax.experimental.pallas import tpu as pltpu


_VMEM_LIMIT = 32 * 1024 * 1024          # scoped VMEM request; safe on v5e/v6e/v7x
_VMEM_BLOCK_BUDGET = 20 * 1024 * 1024   # budget used to derive time_block


def _derive_time_block(seq_len, batch, in_dim, hidden):
    """Pick the recurrence time block from a VMEM budget (v7x has 64 MiB)."""
    if seq_len <= 16:
        return seq_len

    def est(tb):
        x_blk = tb * batch * in_dim * 2 * 2              # bf16 input, 2 buffers
        y_blk = tb * batch * hidden * 2 * 2              # bf16 output, 2 buffers
        g_val = tb * batch * 4 * hidden * 4              # f32 gate pre-activations
        w_blk = (in_dim + hidden) * 4 * hidden * 2 * 2   # bf16 weights, 2 buffers
        misc = 6 * batch * hidden * 4
        return x_blk + y_blk + g_val + w_blk + misc

    tb = 16   # capped at 16: the time loop is statically unrolled (see TODO below)
    while tb > 8 and est(tb) > _VMEM_BLOCK_BUDGET:
        tb //= 2
    return tb


# ----------------------------------------------------------------------------
# Kernels
# ----------------------------------------------------------------------------
def _lstm_layer_kernel(x_ref, wih_ref, whh_ref, b_ref, h0_ref, c0_ref,
                       y_ref, hT_ref, cT_ref, h_sc, c_sc,
                       *, time_block, batch, hidden, seq_len, padded_len):
    """One LSTM layer over one block of `time_block` steps.

    x_ref   : (time_block*B, K) bf16   flattened time-major inputs
    wih_ref : (K, 4H)           bf16   concatenated input weights  [i|f|g|o]
    whh_ref : (H, 4H)           bf16   concatenated recurrent weights
    b_ref   : (1, 4H)           f32    b_ih + b_hh
    h0/c0   : (B, H)            f32    initial state
    y_ref   : (time_block, B, H) bf16  hidden outputs for this time block
    hT/cT   : (B, H)            f32    final state (resident outputs)
    h_sc/c_sc : VMEM scratch carrying the recurrence across grid steps
    """
    tb = pl.program_id(0)

    @pl.when(tb == 0)
    def _():
        h_sc[...] = h0_ref[...]
        c_sc[...] = c0_ref[...]

    # Hoisted input projection for the whole block: ONE lane-dense 4H matmul,
    # off the serial path.  G never leaves VMEM.
    g_all = (jnp.dot(x_ref[...], wih_ref[...],
                     preferred_element_type=jnp.float32)
             + b_ref[...])                                   # (time_block*B, 4H)

    w_hh = whh_ref[...]                                      # (H, 4H) bf16
    h = h_sc[...]
    c = c_sc[...]
    H = hidden
    needs_mask = padded_len != seq_len                       # static Python bool

    # Serial critical path: one fused (B, H) @ (H, 4H) matmul per step.
    # TODO(synk): at production B*H switch to lax.fori_loop(unroll=4..8) with a
    # VMEM gate scratch to bound live ranges; static unroll is fine at <=16 steps.
    for s in range(time_block):
        g_s = g_all[s * batch:(s + 1) * batch, :]            # (B, 4H) static slice
        gates = g_s + jnp.dot(h.astype(jnp.bfloat16), w_hh,
                              preferred_element_type=jnp.float32)

        # TODO(synk): on v6e/v7x the nonlinearities could run in bf16 (2x EUP);
        # kept f32 so the same kernel stays correct/optimal on v5e.
        i_t = jax.nn.sigmoid(gates[:, 0 * H:1 * H])
        f_t = jax.nn.sigmoid(gates[:, 1 * H:2 * H])
        g_t = jnp.tanh(gates[:, 2 * H:3 * H])
        o_t = jax.nn.sigmoid(gates[:, 3 * H:4 * H])

        c_new = f_t * c + i_t * g_t
        h_new = o_t * jnp.tanh(c_new)

        if needs_mask:
            valid = (tb * time_block + s) < seq_len
            h_new = jnp.where(valid, h_new, h)
            c_new = jnp.where(valid, c_new, c)

        y_ref[s] = h_new.astype(y_ref.dtype)
        h, c = h_new, c_new

    h_sc[...] = h
    c_sc[...] = c

    # Final-state writeback only on the last grid step.
    @pl.when(tb == pl.num_programs(0) - 1)
    def _():
        hT_ref[...] = h
        cT_ref[...] = c


def _head_kernel(y_ref, w_ref, b_ref, out_ref):
    """Linear projection to vocab + LogSoftmax(-1) over a flat row tile.

    y_ref   : (rows, H) bf16   flattened time-major hidden states
    w_ref   : (H, V)    bf16
    b_ref   : (1, V)    f32
    out_ref : (rows, V) f32    log-probabilities
    """
    z = (jnp.dot(y_ref[...], w_ref[...], preferred_element_type=jnp.float32)
         + b_ref[...])
    m = jnp.max(z, axis=-1, keepdims=True)
    zs = z - m
    lse = jnp.log(jnp.sum(jnp.exp(zs), axis=-1, keepdims=True))
    out_ref[...] = zs - lse
    # TODO(synk): for production, pad V (w_out/b_out/output) to a multiple of
    # 128 for lane-dense (unmasked) stores; V=48 here keeps semantics simple.


# ----------------------------------------------------------------------------
# pallas_call wrappers
# ----------------------------------------------------------------------------
def lstm_layer(x_flat, w_ih, w_hh, bias, h0, c0, seq_len, time_block):
    """x_flat: (Tp*B, K) bf16 -> (y (Tp,B,H) bf16, hT (B,H) f32, cT (B,H) f32)."""
    rows, K = x_flat.shape
    B, H = h0.shape
    Tp = rows // B
    num_blocks = Tp // time_block

    kernel = functools.partial(
        _lstm_layer_kernel, time_block=time_block, batch=B, hidden=H,
        seq_len=seq_len, padded_len=Tp)

    grid_spec = pltpu.PrefetchScalarGridSpec(
        num_scalar_prefetch=0,
        grid=(num_blocks,),
        in_specs=[
            pl.BlockSpec((time_block * B, K), lambda t: (t, 0)),   # x (flat)
            pl.BlockSpec((K, 4 * H), lambda t: (0, 0)),            # W_ih cat
            pl.BlockSpec((H, 4 * H), lambda t: (0, 0)),            # W_hh cat
            pl.BlockSpec((1, 4 * H), lambda t: (0, 0)),            # bias
            pl.BlockSpec((B, H), lambda t: (0, 0)),                # h0
            pl.BlockSpec((B, H), lambda t: (0, 0)),                # c0
        ],
        out_specs=[
            pl.BlockSpec((time_block, B, H), lambda t: (t, 0, 0)),  # y
            pl.BlockSpec((B, H), lambda t: (0, 0)),                 # hT
            pl.BlockSpec((B, H), lambda t: (0, 0)),                 # cT
        ],
        scratch_shapes=[
            pltpu.VMEM((B, H), jnp.float32),   # h carry
            pltpu.VMEM((B, H), jnp.float32),   # c carry
        ],
    )

    out_shapes = (
        jax.ShapeDtypeStruct((Tp, B, H), jnp.bfloat16),
        jax.ShapeDtypeStruct((B, H), jnp.float32),
        jax.ShapeDtypeStruct((B, H), jnp.float32),
    )

    # TODO(synk): on v7x add a leading batch-parallel grid axis (megacore);
    # the time axis must stay 'arbitrary' so the resident hT/cT remain correct.
    return pl.pallas_call(
        kernel, out_shape=out_shapes, grid_spec=grid_spec,
        compiler_params=pltpu.CompilerParams(
            dimension_semantics=("arbitrary",),
            vmem_limit_bytes=_VMEM_LIMIT),
    )(x_flat, w_ih, w_hh, bias, h0, c0)


def _head_row_block(total_rows, base_rows, target=512):
    """Largest multiple of base_rows that divides total_rows, near `target`."""
    num = total_rows // base_rows
    mult = max(1, min(num, -(-target // base_rows)))
    while num % mult:
        mult -= 1
    return base_rows * mult


def head(y_flat, w_out, b_out, valid_rows, base_rows):
    """y_flat: (Tp*B, H) bf16 -> log-probs (Tp*B, V) f32 (time-major rows).

    Only tiles containing valid (non-padded) rows are computed; trailing padded
    rows of the output are never written (and never read by the wrapper).
    """
    rows, H = y_flat.shape
    V = w_out.shape[1]
    rows_blk = _head_row_block(rows, base_rows)
    num_blocks = -(-valid_rows // rows_blk)

    return pl.pallas_call(
        _head_kernel,
        out_shape=jax.ShapeDtypeStruct((rows, V), jnp.float32),
        grid_spec=pltpu.PrefetchScalarGridSpec(
            num_scalar_prefetch=0,
            grid=(num_blocks,),
            in_specs=[
                pl.BlockSpec((rows_blk, H), lambda i: (i, 0)),
                pl.BlockSpec((H, V), lambda i: (0, 0)),
                pl.BlockSpec((1, V), lambda i: (0, 0)),
            ],
            out_specs=pl.BlockSpec((rows_blk, V), lambda i: (i, 0)),
        ),
        compiler_params=pltpu.CompilerParams(
            dimension_semantics=("parallel",),
            vmem_limit_bytes=_VMEM_LIMIT),
    )(y_flat, w_out, b_out)


# ----------------------------------------------------------------------------
# Full module forward
# ----------------------------------------------------------------------------
def mol_lstm_forward(tokens, params, initial_state=None):
    """tokens: (B, T) int32 -> (log_probs (B,T,V), (h, c) each (B, L, H))."""
    B, T = tokens.shape
    emb = params["embedding"]                     # (V, E) f32, pad row zeroed
    E = emb.shape[1]
    H = params["w_hh"][0].shape[0]
    V = params["w_out"].shape[1]
    L = len(params["w_ih"])

    time_block = _derive_time_block(T, B, E, H)
    num_blocks = (T + time_block - 1) // time_block
    Tp = num_blocks * time_block

    # Embedding gather directly in time-major order; bf16 for the MXU matmuls.
    # TODO(synk): token-table gather stays in XLA (jnp.take); a Pallas gather
    # would need scalar-prefetch DMA and buys nothing at these table sizes.
    x = jnp.take(emb, tokens.T, axis=0).astype(jnp.bfloat16)   # (T, B, E)
    if Tp != T:
        x = jnp.pad(x, ((0, Tp - T), (0, 0), (0, 0)))
    x_flat = x.reshape(Tp * B, E)                 # free leading-dim merge

    if initial_state is None:
        h0 = jnp.zeros((L, B, H), jnp.float32)
        c0 = jnp.zeros((L, B, H), jnp.float32)
    else:
        # Module-facing convention: each tensor is (B, L, H) (DataParallel
        # layout); transpose to the internal per-layer (L, B, H) layout.
        h0_blh, c0_blh = initial_state
        h0 = jnp.transpose(h0_blh, (1, 0, 2)).astype(jnp.float32)
        c0 = jnp.transpose(c0_blh, (1, 0, 2)).astype(jnp.float32)

    h_finals, c_finals = [], []
    y_flat = x_flat
    for layer in range(L):
        y3, hT, cT = lstm_layer(y_flat, params["w_ih"][layer],
                                params["w_hh"][layer], params["bias"][layer],
                                h0[layer], c0[layer], T, time_block)
        y_flat = y3.reshape(Tp * B, H)            # free leading-dim merge
        h_finals.append(hT)
        c_finals.append(cT)
        # TODO(synk): nn.LSTM inter-layer dropout is train-only; none applied.
    # TODO(synk): for small H/L the layers could be fused into one kernel
    # keeping inter-layer y blocks in VMEM (removes the bf16 HBM round trips).

    out_flat = head(y_flat, params["w_out"], params["b_out"],
                    valid_rows=T * B, base_rows=time_block * B)
    # (Tp*B, V) time-major -> (B, T, V); the [:T] slice fuses into the transpose.
    log_probs = out_flat.reshape(Tp, B, V)[:T].transpose(1, 0, 2)

    # Final state batch-first: (B, L, H) each.
    state = (jnp.stack(h_finals, axis=1), jnp.stack(c_finals, axis=1))
    return log_probs, state


# ----------------------------------------------------------------------------
# Pure-JAX reference (same dtype chain) for correctness validation
# ----------------------------------------------------------------------------
def reference_forward(tokens, params, initial_state=None):
    B, T = tokens.shape
    emb = params["embedding"]
    H = params["w_hh"][0].shape[0]
    L = len(params["w_ih"])
    x = jnp.take(emb, tokens.T, axis=0).astype(jnp.bfloat16)   # (T, B, E)

    if initial_state is None:
        h0 = jnp.zeros((L, B, H), jnp.float32)
        c0 = jnp.zeros((L, B, H), jnp.float32)
    else:
        h0 = jnp.transpose(initial_state[0], (1, 0, 2)).astype(jnp.float32)
        c0 = jnp.transpose(initial_state[1], (1, 0, 2)).astype(jnp.float32)

    y = x
    hs, cs = [], []
    for layer in range(L):
        w_ih = params["w_ih"][layer]
        w_hh = params["w_hh"][layer]
        bias = params["bias"][layer]

        def step(carry, x_t):
            h, c = carry
            gates = (jnp.dot(x_t, w_ih, preferred_element_type=jnp.float32)
                     + bias
                     + jnp.dot(h.astype(jnp.bfloat16), w_hh,
                               preferred_element_type=jnp.float32))
            i = jax.nn.sigmoid(gates[:, 0 * H:1 * H])
            f = jax.nn.sigmoid(gates[:, 1 * H:2 * H])
            g = jnp.tanh(gates[:, 2 * H:3 * H])
            o = jax.nn.sigmoid(gates[:, 3 * H:4 * H])
            c_new = f * c + i * g
            h_new = o * jnp.tanh(c_new)
            return (h_new, c_new), h_new.astype(jnp.bfloat16)

        (hT, cT), y = jax.lax.scan(step, (h0[layer], c0[layer]), y)
        hs.append(hT)
        cs.append(cT)

    z = (jnp.dot(y, params["w_out"], preferred_element_type=jnp.float32)
         + params["b_out"])                                    # (T, B, V)
    log_probs = jax.nn.log_softmax(z, axis=-1).transpose(1, 0, 2)
    return log_probs, (jnp.stack(hs, axis=1), jnp.stack(cs, axis=1))


# ----------------------------------------------------------------------------
# Deterministic parameter construction (shapes follow the PyTorch module)
# ----------------------------------------------------------------------------
def make_params(key, vocab_size, embedding_dim, hidden_size, n_layers,
                padding_token_index=None):
    k = 1.0 / float(hidden_size) ** 0.5
    keys = jax.random.split(key, 3 + 4 * n_layers)

    emb = jax.random.normal(keys[0], (vocab_size, embedding_dim), jnp.float32)
    if padding_token_index is not None:
        emb = emb.at[padding_token_index].set(0.0)

    w_ih, w_hh, bias = [], [], []
    for layer in range(n_layers):
        in_dim = embedding_dim if layer == 0 else hidden_size
        kw = keys[3 + 4 * layer: 3 + 4 * layer + 4]
        # Concatenated gate layout [i|f|g|o] along the last (lane) dim.  When
        # loading a real checkpoint, split PyTorch's weight_ih_l{n} (4H, K)
        # along dim 0 in (i, f, g, o) order and transpose into these columns.
        w_ih.append(jax.random.uniform(kw[0], (in_dim, 4 * hidden_size),
                                       jnp.float32, -k, k).astype(jnp.bfloat16))
        w_hh.append(jax.random.uniform(kw[1], (hidden_size, 4 * hidden_size),
                                       jnp.float32, -k, k).astype(jnp.bfloat16))
        b_ih = jax.random.uniform(kw[2], (1, 4 * hidden_size), jnp.float32, -k, k)
        b_hh = jax.random.uniform(kw[3], (1, 4 * hidden_size), jnp.float32, -k, k)
        bias.append(b_ih + b_hh)                  # f32, folded into G

    w_out = jax.random.uniform(keys[1], (hidden_size, vocab_size),
                               jnp.float32, -k, k).astype(jnp.bfloat16)
    b_out = jax.random.uniform(keys[2], (1, vocab_size), jnp.float32, -k, k)

    return {
        "embedding": emb,
        "w_ih": w_ih,
        "w_hh": w_hh,
        "bias": bias,
        "w_out": w_out,
        "b_out": b_out,
    }


if __name__ == "__main__":
    VOCAB = 48
    EMB = 16
    HIDDEN = 32
    LAYERS = 2
    BATCH = 2
    SEQ = 8
    PAD_IDX = 0

    key = jax.random.PRNGKey(0)
    pkey, tkey = jax.random.split(key)

    params = make_params(pkey, VOCAB, EMB, HIDDEN, LAYERS,
                         padding_token_index=PAD_IDX)
    tokens = jax.random.randint(tkey, (BATCH, SEQ), 0, VOCAB, jnp.int32)

    fwd = jax.jit(mol_lstm_forward)
    log_probs, (h, c) = fwd(tokens, params)
    jax.block_until_ready(log_probs)
    jax.block_until_ready(h)
    jax.block_until_ready(c)

    assert log_probs.shape == (BATCH, SEQ, VOCAB)
    assert h.shape == (BATCH, LAYERS, HIDDEN)
    assert c.shape == (BATCH, LAYERS, HIDDEN)
    # log-softmax rows should sum to ~1 in probability space.
    assert jnp.allclose(jnp.sum(jnp.exp(log_probs), axis=-1), 1.0, atol=1e-4)
    assert bool(jnp.all(jnp.isfinite(log_probs)))

    # Numerical check against a pure-JAX reference with the same dtype chain.
    ref_lp, (ref_h, ref_c) = reference_forward(tokens, params)
    assert jnp.allclose(log_probs, ref_lp, atol=2e-2, rtol=2e-2)
    assert jnp.allclose(h, ref_h, atol=2e-2, rtol=2e-2)
    assert jnp.allclose(c, ref_c, atol=2e-2, rtol=2e-2)

    print("KERNEL_OK")
</pallas_src>

<mosaic_0001>
module attributes {stable_mosaic.version = 11 : i64} {
  func.func @_lstm_layer_kernel(%arg0: i32, %arg1: memref<16x32xbf16, #tpu.memory_space<vmem>>, %arg2: memref<32x128xbf16, #tpu.memory_space<vmem>>, %arg3: memref<32x128xbf16, #tpu.memory_space<vmem>>, %arg4: memref<1x128xf32, #tpu.memory_space<vmem>>, %arg5: memref<2x32xf32, #tpu.memory_space<vmem>>, %arg6: memref<2x32xf32, #tpu.memory_space<vmem>>, %arg7: memref<8x2x32xbf16, #tpu.memory_space<vmem>>, %arg8: memref<2x32xf32, #tpu.memory_space<vmem>>, %arg9: memref<2x32xf32, #tpu.memory_space<vmem>>, %arg10: memref<2x32xf32, #tpu.memory_space<vmem>>, %arg11: memref<2x32xf32, #tpu.memory_space<vmem>>) attributes {dimension_semantics = [#tpu.dimension_semantics<arbitrary>], iteration_bounds = array<i64: 1>, scalar_prefetch = 0 : i64, scratch_operands = 2 : i64, tpu.core_type = #tpu.core_type<tc>, window_params = [{transform_indices = @transform_0, window_bounds = array<i64: 16, 32>}, {pipeline_mode = #tpu.pipeline_mode<synchronous>, transform_indices = @transform_1, window_bounds = array<i64: 32, 128>}, {pipeline_mode = #tpu.pipeline_mode<synchronous>, transform_indices = @transform_2, window_bounds = array<i64: 32, 128>}, {pipeline_mode = #tpu.pipeline_mode<synchronous>, transform_indices = @transform_3, window_bounds = array<i64: 1, 128>}, {pipeline_mode = #tpu.pipeline_mode<synchronous>, transform_indices = @transform_4, window_bounds = array<i64: 2, 32>}, {pipeline_mode = #tpu.pipeline_mode<synchronous>, transform_indices = @transform_5, window_bounds = array<i64: 2, 32>}, {transform_indices = @transform_6, window_bounds = array<i64: 8, 2, 32>}, {pipeline_mode = #tpu.pipeline_mode<synchronous>, transform_indices = @transform_7, window_bounds = array<i64: 2, 32>}, {pipeline_mode = #tpu.pipeline_mode<synchronous>, transform_indices = @transform_8, window_bounds = array<i64: 2, 32>}]} {
    %c0_i32 = arith.constant 0 : i32
    %0 = arith.cmpi eq, %arg0, %c0_i32 : i32
    %1 = arith.extui %0 : i1 to i32
    %c0_i32_0 = arith.constant 0 : i32
    %2 = arith.cmpi ne, %1, %c0_i32_0 : i32
    scf.if %2 {
      %c0_67 = arith.constant 0 : index
      %c0_68 = arith.constant 0 : index
      %281 = vector.load %arg5[%c0_67, %c0_68] : memref<2x32xf32, #tpu.memory_space<vmem>>, vector<2x32xf32>
      %c0_69 = arith.constant 0 : index
      %c0_70 = arith.constant 0 : index
      %282 = vector.load %arg10[%c0_69, %c0_70] : memref<2x32xf32, #tpu.memory_space<vmem>>, vector<2x32xf32>
      tpu.vector_store %arg10[%c0_69, %c0_70], %281 {strides = array<i32>} : memref<2x32xf32, #tpu.memory_space<vmem>>, vector<2x32xf32>,
      %c0_71 = arith.constant 0 : index
      %c0_72 = arith.constant 0 : index
      %283 = vector.load %arg6[%c0_71, %c0_72] : memref<2x32xf32, #tpu.memory_space<vmem>>, vector<2x32xf32>
      %c0_73 = arith.constant 0 : index
      %c0_74 = arith.constant 0 : index
      %284 = vector.load %arg11[%c0_73, %c0_74] : memref<2x32xf32, #tpu.memory_space<vmem>>, vector<2x32xf32>
      tpu.vector_store %arg11[%c0_73, %c0_74], %283 {strides = array<i32>} : memref<2x32xf32, #tpu.memory_space<vmem>>, vector<2x32xf32>,
    } else {
    }
    %c0 = arith.constant 0 : index
    %c0_1 = arith.constant 0 : index
    %3 = vector.load %arg1[%c0, %c0_1] : memref<16x32xbf16, #tpu.memory_space<vmem>>, vector<16x32xbf16>
    %c0_2 = arith.constant 0 : index
    %c0_3 = arith.constant 0 : index
    %4 = vector.load %arg2[%c0_2, %c0_3] : memref<32x128xbf16, #tpu.memory_space<vmem>>, vector<32x128xbf16>
    %cst = arith.constant dense<0.000000e+00> : vector<16x128xf32>
    %5 = tpu.matmul %3, %4, %cst {dimension_numbers = #tpu.dot_dimension_numbers<[1], [0], [0], [1], [0, 0, 1, 1], [], []>} : vector<16x32xbf16>, vector<32x128xbf16>, vector<16x128xf32> -> vector<16x128xf32>
    %c0_4 = arith.constant 0 : index
    %c0_5 = arith.constant 0 : index
    %6 = vector.load %arg4[%c0_4, %c0_5] : memref<1x128xf32, #tpu.memory_space<vmem>>, vector<1x128xf32>
    %7 = vector.broadcast %6 : vector<1x128xf32> to vector<16x128xf32>
    %8 = arith.addf %5, %7 : vector<16x128xf32>
    %c0_6 = arith.constant 0 : index
    %c0_7 = arith.constant 0 : index
    %9 = vector.load %arg3[%c0_6, %c0_7] : memref<32x128xbf16, #tpu.memory_space<vmem>>, vector<32x128xbf16>
    %c0_8 = arith.constant 0 : index
    %c0_9 = arith.constant 0 : index
    %10 = vector.load %arg10[%c0_8, %c0_9] : memref<2x32xf32, #tpu.memory_space<vmem>>, vector<2x32xf32>
    %c0_10 = arith.constant 0 : index
    %c0_11 = arith.constant 0 : index
    %11 = vector.load %arg11[%c0_10, %c0_11] : memref<2x32xf32, #tpu.memory_space<vmem>>, vector<2x32xf32>
    %12 = vector.extract_strided_slice %8 {offsets = [0, 0], sizes = [2, 128], strides = [1, 1]} : vector<16x128xf32> to vector<2x128xf32>
    %13 = arith.truncf %10 : vector<2x32xf32> to vector<2x32xbf16>
    %cst_12 = arith.constant dense<0.000000e+00> : vector<2x128xf32>
    %14 = tpu.matmul %13, %9, %cst_12 {dimension_numbers = #tpu.dot_dimension_numbers<[1], [0], [0], [1], [0, 0, 1, 1], [], []>} : vector<2x32xbf16>, vector<32x128xbf16>, vector<2x128xf32> -> vector<2x128xf32>
    %15 = arith.addf %12, %14 : vector<2x128xf32>
    %16 = vector.extract_strided_slice %15 {offsets = [0, 0], sizes = [2, 32], strides = [1, 1]} : vector<2x128xf32> to vector<2x32xf32>
    %17 = arith.negf %16 : vector<2x32xf32>
    %18 = math.exp %17 : vector<2x32xf32>
    %cst_13 = arith.constant 1.000000e+00 : f32
    %19 = vector.broadcast %cst_13 : f32 to vector<2x32xf32>
    %20 = arith.addf %19, %18 : vector<2x32xf32>
    %21 = arith.divf %19, %20 : vector<2x32xf32>
    %22 = vector.extract_strided_slice %15 {offsets = [0, 32], sizes = [2, 32], strides = [1, 1]} : vector<2x128xf32> to vector<2x32xf32>
    %23 = arith.negf %22 : vector<2x32xf32>
    %24 = math.exp %23 : vector<2x32xf32>
    %cst_14 = arith.constant 1.000000e+00 : f32
    %25 = vector.broadcast %cst_14 : f32 to vector<2x32xf32>
    %26 = arith.addf %25, %24 : vector<2x32xf32>
    %27 = arith.divf %25, %26 : vector<2x32xf32>
    %28 = vector.extract_strided_slice %15 {offsets = [0, 64], sizes = [2, 32], strides = [1, 1]} : vector<2x128xf32> to vector<2x32xf32>
    %29 = math.tanh %28 : vector<2x32xf32>
    %30 = vector.extract_strided_slice %15 {offsets = [0, 96], sizes = [2, 32], strides = [1, 1]} : vector<2x128xf32> to vector<2x32xf32>
    %31 = arith.negf %30 : vector<2x32xf32>
    %32 = math.exp %31 : vector<2x32xf32>
    %cst_15 = arith.constant 1.000000e+00 : f32
    %33 = vector.broadcast %cst_15 : f32 to vector<2x32xf32>
    %34 = arith.addf %33, %32 : vector<2x32xf32>
    %35 = arith.divf %33, %34 : vector<2x32xf32>
    %36 = arith.mulf %27, %11 : vector<2x32xf32>
    %37 = arith.mulf %21, %29 : vector<2x32xf32>
    %38 = arith.addf %36, %37 : vector<2x32xf32>
    %39 = math.tanh %38 : vector<2x32xf32>
    %40 = arith.mulf %35, %39 : vector<2x32xf32>
    %41 = arith.truncf %40 : vector<2x32xf32> to vector<2x32xbf16>
    %c0_16 = arith.constant 0 : index
    %c0_17 = arith.constant 0 : index
    %c0_18 = arith.constant 0 : index
    %42 = vector.load %arg7[%c0_16, %c0_17, %c0_18] : memref<8x2x32xbf16, #tpu.memory_space<vmem>>, vector<1x2x32xbf16>
    %43 = vector.shape_cast %42 : vector<1x2x32xbf16> to vector<2x32xbf16>
    %44 = vector.shape_cast %41 : vector<2x32xbf16> to vector<1x2x32xbf16>
    tpu.vector_store %arg7[%c0_16, %c0_17, %c0_18], %44 {strides = array<i32>} : memref<8x2x32xbf16, #tpu.memory_space<vmem>>, vector<1x2x32xbf16>,
    %45 = vector.extract_strided_slice %8 {offsets = [2, 0], sizes = [2, 128], strides = [1, 1]} : vector<16x128xf32> to vector<2x128xf32>
    %46 = arith.truncf %40 : vector<2x32xf32> to vector<2x32xbf16>
    %cst_19 = arith.constant dense<0.000000e+00> : vector<2x128xf32>
    %47 = tpu.matmul %46, %9, %cst_19 {dimension_numbers = #tpu.dot_dimension_numbers<[1], [0], [0], [1], [0, 0, 1, 1], [], []>} : vector<2x32xbf16>, vector<32x128xbf16>, vector<2x128xf32> -> vector<2x128xf32>
    %48 = arith.addf %45, %47 : vector<2x128xf32>
    %49 = vector.extract_strided_slice %48 {offsets = [0, 0], sizes = [2, 32], strides = [1, 1]} : vector<2x128xf32> to vector<2x32xf32>
    %50 = arith.negf %49 : vector<2x32xf32>
    %51 = math.exp %50 : vector<2x32xf32>
    %cst_20 = arith.constant 1.000000e+00 : f32
    %52 = vector.broadcast %cst_20 : f32 to vector<2x32xf32>
    %53 = arith.addf %52, %51 : vector<2x32xf32>
    %54 = arith.divf %52, %53 : vector<2x32xf32>
    %55 = vector.extract_strided_slice %48 {offsets = [0, 32], sizes = [2, 32], strides = [1, 1]} : vector<2x128xf32> to vector<2x32xf32>
    %56 = arith.negf %55 : vector<2x32xf32>
    %57 = math.exp %56 : vector<2x32xf32>
    %cst_21 = arith.constant 1.000000e+00 : f32
    %58 = vector.broadcast %cst_21 : f32 to vector<2x32xf32>
    %59 = arith.addf %58, %57 : vector<2x32xf32>
    %60 = arith.divf %58, %59 : vector<2x32xf32>
    %61 = vector.extract_strided_slice %48 {offsets = [0, 64], sizes = [2, 32], strides = [1, 1]} : vector<2x128xf32> to vector<2x32xf32>
    %62 = math.tanh %61 : vector<2x32xf32>
    %63 = vector.extract_strided_slice %48 {offsets = [0, 96], sizes = [2, 32], strides = [1, 1]} : vector<2x128xf32> to vector<2x32xf32>
    %64 = arith.negf %63 : vector<2x32xf32>
    %65 = math.exp %64 : vector<2x32xf32>
    %cst_22 = arith.constant 1.000000e+00 : f32
    %66 = vector.broadcast %cst_22 : f32 to vector<2x32xf32>
    %67 = arith.addf %66, %65 : vector<2x32xf32>
    %68 = arith.divf %66, %67 : vector<2x32xf32>
    %69 = arith.mulf %60, %38 : vector<2x32xf32>
    %70 = arith.mulf %54, %62 : vector<2x32xf32>
    %71 = arith.addf %69, %70 : vector<2x32xf32>
    %72 = math.tanh %71 : vector<2x32xf32>
    %73 = arith.mulf %68, %72 : vector<2x32xf32>
    %74 = arith.truncf %73 : vector<2x32xf32> to vector<2x32xbf16>
    %c1 = arith.constant 1 : index
    %c0_23 = arith.constant 0 : index
    %c0_24 = arith.constant 0 : index
    %75 = vector.load %arg7[%c1, %c0_23, %c0_24] : memref<8x2x32xbf16, #tpu.memory_space<vmem>>, vector<1x2x32xbf16>
    %76 = vector.shape_cast %75 : vector<1x2x32xbf16> to vector<2x32xbf16>
    %77 = vector.shape_cast %74 : vector<2x32xbf16> to vector<1x2x32xbf16>
    tpu.vector_store %arg7[%c1, %c0_23, %c0_24], %77 {strides = array<i32>} : memref<8x2x32xbf16, #tpu.memory_space<vmem>>, vector<1x2x32xbf16>,
    %78 = vector.extract_strided_slice %8 {offsets = [4, 0], sizes = [2, 128], strides = [1, 1]} : vector<16x128xf32> to vector<2x128xf32>
    %79 = arith.truncf %73 : vector<2x32xf32> to vector<2x32xbf16>
    %cst_25 = arith.constant dense<0.000000e+00> : vector<2x128xf32>
    %80 = tpu.matmul %79, %9, %cst_25 {dimension_numbers = #tpu.dot_dimension_numbers<[1], [0], [0], [1], [0, 0, 1, 1], [], []>} : vector<2x32xbf16>, vector<32x128xbf16>, vector<2x128xf32> -> vector<2x128xf32>
    %81 = arith.addf %78, %80 : vector<2x128xf32>
    %82 = vector.extract_strided_slice %81 {offsets = [0, 0], sizes = [2, 32], strides = [1, 1]} : vector<2x128xf32> to vector<2x32xf32>
    %83 = arith.negf %82 : vector<2x32xf32>
    %84 = math.exp %83 : vector<2x32xf32>
    %cst_26 = arith.constant 1.000000e+00 : f32
    %85 = vector.broadcast %cst_26 : f32 to vector<2x32xf32>
    %86 = arith.addf %85, %84 : vector<2x32xf32>
    %87 = arith.divf %85, %86 : vector<2x32xf32>
    %88 = vector.extract_strided_slice %81 {offsets = [0, 32], sizes = [2, 32], strides = [1, 1]} : vector<2x128xf32> to vector<2x32xf32>
    %89 = arith.negf %88 : vector<2x32xf32>
    %90 = math.exp %89 : vector<2x32xf32>
    %cst_27 = arith.constant 1.000000e+00 : f32
    %91 = vector.broadcast %cst_27 : f32 to vector<2x32xf32>
    %92 = arith.addf %91, %90 : vector<2x32xf32>
    %93 = arith.divf %91, %92 : vector<2x32xf32>
    %94 = vector.extract_strided_slice %81 {offsets = [0, 64], sizes = [2, 32], strides = [1, 1]} : vector<2x128xf32> to vector<2x32xf32>
    %95 = math.tanh %94 : vector<2x32xf32>
    %96 = vector.extract_strided_slice %81 {offsets = [0, 96], sizes = [2, 32], strides = [1, 1]} : vector<2x128xf32> to vector<2x32xf32>
    %97 = arith.negf %96 : vector<2x32xf32>
    %98 = math.exp %97 : vector<2x32xf32>
    %cst_28 = arith.constant 1.000000e+00 : f32
    %99 = vector.broadcast %cst_28 : f32 to vector<2x32xf32>
    %100 = arith.addf %99, %98 : vector<2x32xf32>
    %101 = arith.divf %99, %100 : vector<2x32xf32>
    %102 = arith.mulf %93, %71 : vector<2x32xf32>
    %103 = arith.mulf %87, %95 : vector<2x32xf32>
    %104 = arith.addf %102, %103 : vector<2x32xf32>
    %105 = math.tanh %104 : vector<2x32xf32>
    %106 = arith.mulf %101, %105 : vector<2x32xf32>
    %107 = arith.truncf %106 : vector<2x32xf32> to vector<2x32xbf16>
    %c2 = arith.constant 2 : index
    %c0_29 = arith.constant 0 : index
    %c0_30 = arith.constant 0 : index
    %108 = vector.load %arg7[%c2, %c0_29, %c0_30] : memref<8x2x32xbf16, #tpu.memory_space<vmem>>, vector<1x2x32xbf16>
    %109 = vector.shape_cast %108 : vector<1x2x32xbf16> to vector<2x32xbf16>
    %110 = vector.shape_cast %107 : vector<2x32xbf16> to vector<1x2x32xbf16>
    tpu.vector_store %arg7[%c2, %c0_29, %c0_30], %110 {strides = array<i32>} : memref<8x2x32xbf16, #tpu.memory_space<vmem>>, vector<1x2x32xbf16>,
    %111 = vector.extract_strided_slice %8 {offsets = [6, 0], sizes = [2, 128], strides = [1, 1]} : vector<16x128xf32> to vector<2x128xf32>
    %112 = arith.truncf %106 : vector<2x32xf32> to vector<2x32xbf16>
    %cst_31 = arith.constant dense<0.000000e+00> : vector<2x128xf32>
    %113 = tpu.matmul %112, %9, %cst_31 {dimension_numbers = #tpu.dot_dimension_numbers<[1], [0], [0], [1], [0, 0, 1, 1], [], []>} : vector<2x32xbf16>, vector<32x128xbf16>, vector<2x128xf32> -> vector<2x128xf32>
    %114 = arith.addf %111, %113 : vector<2x128xf32>
    %115 = vector.extract_strided_slice %114 {offsets = [0, 0], sizes = [2, 32], strides = [1, 1]} : vector<2x128xf32> to vector<2x32xf32>
    %116 = arith.negf %115 : vector<2x32xf32>
    %117 = math.exp %116 : vector<2x32xf32>
    %cst_32 = arith.constant 1.000000e+00 : f32
    %118 = vector.broadcast %cst_32 : f32 to vector<2x32xf32>
    %119 = arith.addf %118, %117 : vector<2x32xf32>
    %120 = arith.divf %118, %119 : vector<2x32xf32>
    %121 = vector.extract_strided_slice %114 {offsets = [0, 32], sizes = [2, 32], strides = [1, 1]} : vector<2x128xf32> to vector<2x32xf32>
    %122 = arith.negf %121 : vector<2x32xf32>
    %123 = math.exp %122 : vector<2x32xf32>
    %cst_33 = arith.constant 1.000000e+00 : f32
    %124 = vector.broadcast %cst_33 : f32 to vector<2x32xf32>
    %125 = arith.addf %124, %123 : vector<2x32xf32>
    %126 = arith.divf %124, %125 : vector<2x32xf32>
    %127 = vector.extract_strided_slice %114 {offsets = [0, 64], sizes = [2, 32], strides = [1, 1]} : vector<2x128xf32> to vector<2x32xf32>
    %128 = math.tanh %127 : vector<2x32xf32>
    %129 = vector.extract_strided_slice %114 {offsets = [0, 96], sizes = [2, 32], strides = [1, 1]} : vector<2x128xf32> to vector<2x32xf32>
    %130 = arith.negf %129 : vector<2x32xf32>
    %131 = math.exp %130 : vector<2x32xf32>
    %cst_34 = arith.constant 1.000000e+00 : f32
    %132 = vector.broadcast %cst_34 : f32 to vector<2x32xf32>
    %133 = arith.addf %132, %131 : vector<2x32xf32>
    %134 = arith.divf %132, %133 : vector<2x32xf32>
    %135 = arith.mulf %126, %104 : vector<2x32xf32>
    %136 = arith.mulf %120, %128 : vector<2x32xf32>
    %137 = arith.addf %135, %136 : vector<2x32xf32>
    %138 = math.tanh %137 : vector<2x32xf32>
    %139 = arith.mulf %134, %138 : vector<2x32xf32>
    %140 = arith.truncf %139 : vector<2x32xf32> to vector<2x32xbf16>
    %c3 = arith.constant 3 : index
    %c0_35 = arith.constant 0 : index
    %c0_36 = arith.constant 0 : index
    %141 = vector.load %arg7[%c3, %c0_35, %c0_36] : memref<8x2x32xbf16, #tpu.memory_space<vmem>>, vector<1x2x32xbf16>
    %142 = vector.shape_cast %141 : vector<1x2x32xbf16> to vector<2x32xbf16>
    %143 = vector.shape_cast %140 : vector<2x32xbf16> to vector<1x2x32xbf16>
    tpu.vector_store %arg7[%c3, %c0_35, %c0_36], %143 {strides = array<i32>} : memref<8x2x32xbf16, #tpu.memory_space<vmem>>, vector<1x2x32xbf16>,
    %144 = vector.extract_strided_slice %8 {offsets = [8, 0], sizes = [2, 128], strides = [1, 1]} : vector<16x128xf32> to vector<2x128xf32>
    %145 = arith.truncf %139 : vector<2x32xf32> to vector<2x32xbf16>
    %cst_37 = arith.constant dense<0.000000e+00> : vector<2x128xf32>
    %146 = tpu.matmul %145, %9, %cst_37 {dimension_numbers = #tpu.dot_dimension_numbers<[1], [0], [0], [1], [0, 0, 1, 1], [], []>} : vector<2x32xbf16>, vector<32x128xbf16>, vector<2x128xf32> -> vector<2x128xf32>
    %147 = arith.addf %144, %146 : vector<2x128xf32>
    %148 = vector.extract_strided_slice %147 {offsets = [0, 0], sizes = [2, 32], strides = [1, 1]} : vector<2x128xf32> to vector<2x32xf32>
    %149 = arith.negf %148 : vector<2x32xf32>
    %150 = math.exp %149 : vector<2x32xf32>
    %cst_38 = arith.constant 1.000000e+00 : f32
    %151 = vector.broadcast %cst_38 : f32 to vector<2x32xf32>
    %152 = arith.addf %151, %150 : vector<2x32xf32>
    %153 = arith.divf %151, %152 : vector<2x32xf32>
    %154 = vector.extract_strided_slice %147 {offsets = [0, 32], sizes = [2, 32], strides = [1, 1]} : vector<2x128xf32> to vector<2x32xf32>
    %155 = arith.negf %154 : vector<2x32xf32>
    %156 = math.exp %155 : vector<2x32xf32>
    %cst_39 = arith.constant 1.000000e+00 : f32
    %157 = vector.broadcast %cst_39 : f32 to vector<2x32xf32>
    %158 = arith.addf %157, %156 : vector<2x32xf32>
    %159 = arith.divf %157, %158 : vector<2x32xf32>
    %160 = vector.extract_strided_slice %147 {offsets = [0, 64], sizes = [2, 32], strides = [1, 1]} : vector<2x128xf32> to vector<2x32xf32>
    %161 = math.tanh %160 : vector<2x32xf32>
    %162 = vector.extract_strided_slice %147 {offsets = [0, 96], sizes = [2, 32], strides = [1, 1]} : vector<2x128xf32> to vector<2x32xf32>
    %163 = arith.negf %162 : vector<2x32xf32>
    %164 = math.exp %163 : vector<2x32xf32>
    %cst_40 = arith.constant 1.000000e+00 : f32
    %165 = vector.broadcast %cst_40 : f32 to vector<2x32xf32>
    %166 = arith.addf %165, %164 : vector<2x32xf32>
    %167 = arith.divf %165, %166 : vector<2x32xf32>
    %168 = arith.mulf %159, %137 : vector<2x32xf32>
    %169 = arith.mulf %153, %161 : vector<2x32xf32>
    %170 = arith.addf %168, %169 : vector<2x32xf32>
    %171 = math.tanh %170 : vector<2x32xf32>
    %172 = arith.mulf %167, %171 : vector<2x32xf32>
    %173 = arith.truncf %172 : vector<2x32xf32> to vector<2x32xbf16>
    %c4 = arith.constant 4 : index
    %c0_41 = arith.constant 0 : index
    %c0_42 = arith.constant 0 : index
    %174 = vector.load %arg7[%c4, %c0_41, %c0_42] : memref<8x2x32xbf16, #tpu.memory_space<vmem>>, vector<1x2x32xbf16>
    %175 = vector.shape_cast %174 : vector<1x2x32xbf16> to vector<2x32xbf16>
    %176 = vector.shape_cast %173 : vector<2x32xbf16> to vector<1x2x32xbf16>
    tpu.vector_store %arg7[%c4, %c0_41, %c0_42], %176 {strides = array<i32>} : memref<8x2x32xbf16, #tpu.memory_space<vmem>>, vector<1x2x32xbf16>,
    %177 = vector.extract_strided_slice %8 {offsets = [10, 0], sizes = [2, 128], strides = [1, 1]} : vector<16x128xf32> to vector<2x128xf32>
    %178 = arith.truncf %172 : vector<2x32xf32> to vector<2x32xbf16>
    %cst_43 = arith.constant dense<0.000000e+00> : vector<2x128xf32>
    %179 = tpu.matmul %178, %9, %cst_43 {dimension_numbers = #tpu.dot_dimension_numbers<[1], [0], [0], [1], [0, 0, 1, 1], [], []>} : vector<2x32xbf16>, vector<32x128xbf16>, vector<2x128xf32> -> vector<2x128xf32>
    %180 = arith.addf %177, %179 : vector<2x128xf32>
    %181 = vector.extract_strided_slice %180 {offsets = [0, 0], sizes = [2, 32], strides = [1, 1]} : vector<2x128xf32> to vector<2x32xf32>
    %182 = arith.negf %181 : vector<2x32xf32>
    %183 = math.exp %182 : vector<2x32xf32>
    %cst_44 = arith.constant 1.000000e+00 : f32
    %184 = vector.broadcast %cst_44 : f32 to vector<2x32xf32>
    %185 = arith.addf %184, %183 : vector<2x32xf32>
    %186 = arith.divf %184, %185 : vector<2x32xf32>
    %187 = vector.extract_strided_slice %180 {offsets = [0, 32], sizes = [2, 32], strides = [1, 1]} : vector<2x128xf32> to vector<2x32xf32>
    %188 = arith.negf %187 : vector<2x32xf32>
    %189 = math.exp %188 : vector<2x32xf32>
    %cst_45 = arith.constant 1.000000e+00 : f32
    %190 = vector.broadcast %cst_45 : f32 to vector<2x32xf32>
    %191 = arith.addf %190, %189 : vector<2x32xf32>
    %192 = arith.divf %190, %191 : vector<2x32xf32>
    %193 = vector.extract_strided_slice %180 {offsets = [0, 64], sizes = [2, 32], strides = [1, 1]} : vector<2x128xf32> to vector<2x32xf32>
    %194 = math.tanh %193 : vector<2x32xf32>
    %195 = vector.extract_strided_slice %180 {offsets = [0, 96], sizes = [2, 32], strides = [1, 1]} : vector<2x128xf32> to vector<2x32xf32>
    %196 = arith.negf %195 : vector<2x32xf32>
    %197 = math.exp %196 : vector<2x32xf32>
    %cst_46 = arith.constant 1.000000e+00 : f32
    %198 = vector.broadcast %cst_46 : f32 to vector<2x32xf32>
    %199 = arith.addf %198, %197 : vector<2x32xf32>
    %200 = arith.divf %198, %199 : vector<2x32xf32>
    %201 = arith.mulf %192, %170 : vector<2x32xf32>
    %202 = arith.mulf %186, %194 : vector<2x32xf32>
    %203 = arith.addf %201, %202 : vector<2x32xf32>
    %204 = math.tanh %203 : vector<2x32xf32>
    %205 = arith.mulf %200, %204 : vector<2x32xf32>
    %206 = arith.truncf %205 : vector<2x32xf32> to vector<2x32xbf16>
    %c5 = arith.constant 5 : index
    %c0_47 = arith.constant 0 : index
    %c0_48 = arith.constant 0 : index
    %207 = vector.load %arg7[%c5, %c0_47, %c0_48] : memref<8x2x32xbf16, #tpu.memory_space<vmem>>, vector<1x2x32xbf16>
    %208 = vector.shape_cast %207 : vector<1x2x32xbf16> to vector<2x32xbf16>
    %209 = vector.shape_cast %206 : vector<2x32xbf16> to vector<1x2x32xbf16>
    tpu.vector_store %arg7[%c5, %c0_47, %c0_48], %209 {strides = array<i32>} : memref<8x2x32xbf16, #tpu.memory_space<vmem>>, vector<1x2x32xbf16>,
    %210 = vector.extract_strided_slice %8 {offsets = [12, 0], sizes = [2, 128], strides = [1, 1]} : vector<16x128xf32> to vector<2x128xf32>
    %211 = arith.truncf %205 : vector<2x32xf32> to vector<2x32xbf16>
    %cst_49 = arith.constant dense<0.000000e+00> : vector<2x128xf32>
    %212 = tpu.matmul %211, %9, %cst_49 {dimension_numbers = #tpu.dot_dimension_numbers<[1], [0], [0], [1], [0, 0, 1, 1], [], []>} : vector<2x32xbf16>, vector<32x128xbf16>, vector<2x128xf32> -> vector<2x128xf32>
    %213 = arith.addf %210, %212 : vector<2x128xf32>
    %214 = vector.extract_strided_slice %213 {offsets = [0, 0], sizes = [2, 32], strides = [1, 1]} : vector<2x128xf32> to vector<2x32xf32>
    %215 = arith.negf %214 : vector<2x32xf32>
    %216 = math.exp %215 : vector<2x32xf32>
    %cst_50 = arith.constant 1.000000e+00 : f32
    %217 = vector.broadcast %cst_50 : f32 to vector<2x32xf32>
    %218 = arith.addf %217, %216 : vector<2x32xf32>
    %219 = arith.divf %217, %218 : vector<2x32xf32>
    %220 = vector.extract_strided_slice %213 {offsets = [0, 32], sizes = [2, 32], strides = [1, 1]} : vector<2x128xf32> to vector<2x32xf32>
    %221 = arith.negf %220 : vector<2x32xf32>
    %222 = math.exp %221 : vector<2x32xf32>
    %cst_51 = arith.constant 1.000000e+00 : f32
    %223 = vector.broadcast %cst_51 : f32 to vector<2x32xf32>
    %224 = arith.addf %223, %222 : vector<2x32xf32>
    %225 = arith.divf %223, %224 : vector<2x32xf32>
    %226 = vector.extract_strided_slice %213 {offsets = [0, 64], sizes = [2, 32], strides = [1, 1]} : vector<2x128xf32> to vector<2x32xf32>
    %227 = math.tanh %226 : vector<2x32xf32>
    %228 = vector.extract_strided_slice %213 {offsets = [0, 96], sizes = [2, 32], strides = [1, 1]} : vector<2x128xf32> to vector<2x32xf32>
    %229 = arith.negf %228 : vector<2x32xf32>
    %230 = math.exp %229 : vector<2x32xf32>
    %cst_52 = arith.constant 1.000000e+00 : f32
    %231 = vector.broadcast %cst_52 : f32 to vector<2x32xf32>
    %232 = arith.addf %231, %230 : vector<2x32xf32>
    %233 = arith.divf %231, %232 : vector<2x32xf32>
    %234 = arith.mulf %225, %203 : vector<2x32xf32>
    %235 = arith.mulf %219, %227 : vector<2x32xf32>
    %236 = arith.addf %234, %235 : vector<2x32xf32>
    %237 = math.tanh %236 : vector<2x32xf32>
    %238 = arith.mulf %233, %237 : vector<2x32xf32>
    %239 = arith.truncf %238 : vector<2x32xf32> to vector<2x32xbf16>
    %c6 = arith.constant 6 : index
    %c0_53 = arith.constant 0 : index
    %c0_54 = arith.constant 0 : index
    %240 = vector.load %arg7[%c6, %c0_53, %c0_54] : memref<8x2x32xbf16, #tpu.memory_space<vmem>>, vector<1x2x32xbf16>
    %241 = vector.shape_cast %240 : vector<1x2x32xbf16> to vector<2x32xbf16>
    %242 = vector.shape_cast %239 : vector<2x32xbf16> to vector<1x2x32xbf16>
    tpu.vector_store %arg7[%c6, %c0_53, %c0_54], %242 {strides = array<i32>} : memref<8x2x32xbf16, #tpu.memory_space<vmem>>, vector<1x2x32xbf16>,
    %243 = vector.extract_strided_slice %8 {offsets = [14, 0], sizes = [2, 128], strides = [1, 1]} : vector<16x128xf32> to vector<2x128xf32>
    %244 = arith.truncf %238 : vector<2x32xf32> to vector<2x32xbf16>
    %cst_55 = arith.constant dense<0.000000e+00> : vector<2x128xf32>
    %245 = tpu.matmul %244, %9, %cst_55 {dimension_numbers = #tpu.dot_dimension_numbers<[1], [0], [0], [1], [0, 0, 1, 1], [], []>} : vector<2x32xbf16>, vector<32x128xbf16>, vector<2x128xf32> -> vector<2x128xf32>
    %246 = arith.addf %243, %245 : vector<2x128xf32>
    %247 = vector.extract_strided_slice %246 {offsets = [0, 0], sizes = [2, 32], strides = [1, 1]} : vector<2x128xf32> to vector<2x32xf32>
    %248 = arith.negf %247 : vector<2x32xf32>
    %249 = math.exp %248 : vector<2x32xf32>
    %cst_56 = arith.constant 1.000000e+00 : f32
    %250 = vector.broadcast %cst_56 : f32 to vector<2x32xf32>
    %251 = arith.addf %250, %249 : vector<2x32xf32>
    %252 = arith.divf %250, %251 : vector<2x32xf32>
    %253 = vector.extract_strided_slice %246 {offsets = [0, 32], sizes = [2, 32], strides = [1, 1]} : vector<2x128xf32> to vector<2x32xf32>
    %254 = arith.negf %253 : vector<2x32xf32>
    %255 = math.exp %254 : vector<2x32xf32>
    %cst_57 = arith.constant 1.000000e+00 : f32
    %256 = vector.broadcast %cst_57 : f32 to vector<2x32xf32>
    %257 = arith.addf %256, %255 : vector<2x32xf32>
    %258 = arith.divf %256, %257 : vector<2x32xf32>
    %259 = vector.extract_strided_slice %246 {offsets = [0, 64], sizes = [2, 32], strides = [1, 1]} : vector<2x128xf32> to vector<2x32xf32>
    %260 = math.tanh %259 : vector<2x32xf32>
    %261 = vector.extract_strided_slice %246 {offsets = [0, 96], sizes = [2, 32], strides = [1, 1]} : vector<2x128xf32> to vector<2x32xf32>
    %262 = arith.negf %261 : vector<2x32xf32>
    %263 = math.exp %262 : vector<2x32xf32>
    %cst_58 = arith.constant 1.000000e+00 : f32
    %264 = vector.broadcast %cst_58 : f32 to vector<2x32xf32>
    %265 = arith.addf %264, %263 : vector<2x32xf32>
    %266 = arith.divf %264, %265 : vector<2x32xf32>
    %267 = arith.mulf %258, %236 : vector<2x32xf32>
    %268 = arith.mulf %252, %260 : vector<2x32xf32>
    %269 = arith.addf %267, %268 : vector<2x32xf32>
    %270 = math.tanh %269 : vector<2x32xf32>
    %271 = arith.mulf %266, %270 : vector<2x32xf32>
    %272 = arith.truncf %271 : vector<2x32xf32> to vector<2x32xbf16>
    %c7 = arith.constant 7 : index
    %c0_59 = arith.constant 0 : index
    %c0_60 = arith.constant 0 : index
    %273 = vector.load %arg7[%c7, %c0_59, %c0_60] : memref<8x2x32xbf16, #tpu.memory_space<vmem>>, vector<1x2x32xbf16>
    %274 = vector.shape_cast %273 : vector<1x2x32xbf16> to vector<2x32xbf16>
    %275 = vector.shape_cast %272 : vector<2x32xbf16> to vector<1x2x32xbf16>
    tpu.vector_store %arg7[%c7, %c0_59, %c0_60], %275 {strides = array<i32>} : memref<8x2x32xbf16, #tpu.memory_space<vmem>>, vector<1x2x32xbf16>,
    %c0_61 = arith.constant 0 : index
    %c0_62 = arith.constant 0 : index
    %276 = vector.load %arg10[%c0_61, %c0_62] : memref<2x32xf32, #tpu.memory_space<vmem>>, vector<2x32xf32>
    tpu.vector_store %arg10[%c0_61, %c0_62], %271 {strides = array<i32>} : memref<2x32xf32, #tpu.memory_space<vmem>>, vector<2x32xf32>,
    %c0_63 = arith.constant 0 : index
    %c0_64 = arith.constant 0 : index
    %277 = vector.load %arg11[%c0_63, %c0_64] : memref<2x32xf32, #tpu.memory_space<vmem>>, vector<2x32xf32>
    tpu.vector_store %arg11[%c0_63, %c0_64], %269 {strides = array<i32>} : memref<2x32xf32, #tpu.memory_space<vmem>>, vector<2x32xf32>,
    %c0_i32_65 = arith.constant 0 : i32
    %278 = arith.cmpi eq, %arg0, %c0_i32_65 : i32
    %279 = arith.extui %278 : i1 to i32
    %c0_i32_66 = arith.constant 0 : i32
    %280 = arith.cmpi ne, %279, %c0_i32_66 : i32
    scf.if %280 {
      %c0_67 = arith.constant 0 : index
      %c0_68 = arith.constant 0 : index
      %281 = vector.load %arg8[%c0_67, %c0_68] : memref<2x32xf32, #tpu.memory_space<vmem>>, vector<2x32xf32>
      tpu.vector_store %arg8[%c0_67, %c0_68], %271 {strides = array<i32>} : memref<2x32xf32, #tpu.memory_space<vmem>>, vector<2x32xf32>,
      %c0_69 = arith.constant 0 : index
      %c0_70 = arith.constant 0 : index
      %282 = vector.load %arg9[%c0_69, %c0_70] : memref<2x32xf32, #tpu.memory_space<vmem>>, vector<2x32xf32>
      tpu.vector_store %arg9[%c0_69, %c0_70], %269 {strides = array<i32>} : memref<2x32xf32, #tpu.memory_space<vmem>>, vector<2x32xf32>,
    } else {
    }
    return
  }
  func.func @transform_0(%arg0: i32) -> (i32, i32) {
    %c0_i32 = arith.constant 0 : i32
    %c0_i32_0 = arith.constant 0 : i32
    return %arg0, %c0_i32 : i32, i32
  }
  func.func @transform_1(%arg0: i32) -> (i32, i32) {
    %c0_i32 = arith.constant 0 : i32
    %c0_i32_0 = arith.constant 0 : i32
    %c0_i32_1 = arith.constant 0 : i32
    return %c0_i32, %c0_i32_0 : i32, i32
  }
  func.func @transform_2(%arg0: i32) -> (i32, i32) {
    %c0_i32 = arith.constant 0 : i32
    %c0_i32_0 = arith.constant 0 : i32
    %c0_i32_1 = arith.constant 0 : i32
    return %c0_i32, %c0_i32_0 : i32, i32
  }
  func.func @transform_3(%arg0: i32) -> (i32, i32) {
    %c0_i32 = arith.constant 0 : i32
    %c0_i32_0 = arith.constant 0 : i32
    %c0_i32_1 = arith.constant 0 : i32
    return %c0_i32, %c0_i32_0 : i32, i32
  }
  func.func @transform_4(%arg0: i32) -> (i32, i32) {
    %c0_i32 = arith.constant 0 : i32
    %c0_i32_0 = arith.constant 0 : i32
    %c0_i32_1 = arith.constant 0 : i32
    return %c0_i32, %c0_i32_0 : i32, i32
  }
  func.func @transform_5(%arg0: i32) -> (i32, i32) {
    %c0_i32 = arith.constant 0 : i32
    %c0_i32_0 = arith.constant 0 : i32
    %c0_i32_1 = arith.constant 0 : i32
    return %c0_i32, %c0_i32_0 : i32, i32
  }
  func.func @transform_6(%arg0: i32) -> (i32, i32, i32) {
    %c0_i32 = arith.constant 0 : i32
    %c0_i32_0 = arith.constant 0 : i32
    %c0_i32_1 = arith.constant 0 : i32
    return %arg0, %c0_i32, %c0_i32_0 : i32, i32, i32
  }
  func.func @transform_7(%arg0: i32) -> (i32, i32) {
    %c0_i32 = arith.constant 0 : i32
    %c0_i32_0 = arith.constant 0 : i32
    %c0_i32_1 = arith.constant 0 : i32
    return %c0_i32, %c0_i32_0 : i32, i32
  }
  func.func @transform_8(%arg0: i32) -> (i32, i32) {
    %c0_i32 = arith.constant 0 : i32
    %c0_i32_0 = arith.constant 0 : i32
    %c0_i32_1 = arith.constant 0 : i32
    return %c0_i32, %c0_i32_0 : i32, i32
  }
}

module attributes {stable_mosaic.version = 11 : i64} {
  func.func @_head_kernel(%arg0: i32, %arg1: memref<16x32xbf16, #tpu.memory_space<vmem>>, %arg2: memref<32x48xbf16, #tpu.memory_space<vmem>>, %arg3: memref<1x48xf32, #tpu.memory_space<vmem>>, %arg4: memref<16x48xf32, #tpu.memory_space<vmem>>) attributes {dimension_semantics = [#tpu.dimension_semantics<parallel>], iteration_bounds = array<i64: 1>, scalar_prefetch = 0 : i64, scratch_operands = 0 : i64, tpu.core_type = #tpu.core_type<tc>, window_params = [{transform_indices = @transform_0, window_bounds = array<i64: 16, 32>}, {pipeline_mode = #tpu.pipeline_mode<synchronous>, transform_indices = @transform_1, window_bounds = array<i64: 32, 48>}, {pipeline_mode = #tpu.pipeline_mode<synchronous>, transform_indices = @transform_2, window_bounds = array<i64: 1, 48>}, {transform_indices = @transform_3, window_bounds = array<i64: 16, 48>}]} {
    %c0 = arith.constant 0 : index
    %c0_0 = arith.constant 0 : index
    %0 = vector.load %arg1[%c0, %c0_0] : memref<16x32xbf16, #tpu.memory_space<vmem>>, vector<16x32xbf16>
    %c0_1 = arith.constant 0 : index
    %c0_2 = arith.constant 0 : index
    %1 = vector.load %arg2[%c0_1, %c0_2] : memref<32x48xbf16, #tpu.memory_space<vmem>>, vector<32x48xbf16>
    %cst = arith.constant dense<0.000000e+00> : vector<16x48xf32>
    %2 = tpu.matmul %0, %1, %cst {dimension_numbers = #tpu.dot_dimension_numbers<[1], [0], [0], [1], [0, 0, 1, 1], [], []>} : vector<16x32xbf16>, vector<32x48xbf16>, vector<16x48xf32> -> vector<16x48xf32>
    %c0_3 = arith.constant 0 : index
    %c0_4 = arith.constant 0 : index
    %3 = vector.load %arg3[%c0_3, %c0_4] : memref<1x48xf32, #tpu.memory_space<vmem>>, vector<1x48xf32>
    %4 = vector.broadcast %3 : vector<1x48xf32> to vector<16x48xf32>
    %5 = arith.addf %2, %4 : vector<16x48xf32>
    %cst_5 = arith.constant dense<0xFF800000> : vector<16xf32>
    %6 = vector.multi_reduction <maximumf>, %5, %cst_5 [1] : vector<16x48xf32> to vector<16xf32>
    %7 = vector.shape_cast %6 : vector<16xf32> to vector<16x1xf32>
    %8 = vector.broadcast %7 : vector<16x1xf32> to vector<16x48xf32>
    %9 = arith.subf %5, %8 : vector<16x48xf32>
    %10 = math.exp %9 : vector<16x48xf32>
    %cst_6 = arith.constant dense<0.000000e+00> : vector<16xf32>
    %11 = vector.multi_reduction <add>, %10, %cst_6 [1] : vector<16x48xf32> to vector<16xf32>
    %12 = vector.shape_cast %11 : vector<16xf32> to vector<16x1xf32>
    %13 = math.log %12 : vector<16x1xf32>
    %14 = vector.broadcast %13 : vector<16x1xf32> to vector<16x48xf32>
    %15 = arith.subf %9, %14 : vector<16x48xf32>
    %c0_7 = arith.constant 0 : index
    %c0_8 = arith.constant 0 : index
    %16 = vector.load %arg4[%c0_7, %c0_8] : memref<16x48xf32, #tpu.memory_space<vmem>>, vector<16x48xf32>
    tpu.vector_store %arg4[%c0_7, %c0_8], %15 {strides = array<i32>} : memref<16x48xf32, #tpu.memory_space<vmem>>, vector<16x48xf32>,
    return
  }
  func.func @transform_0(%arg0: i32) -> (i32, i32) {
    %c0_i32 = arith.constant 0 : i32
    %c0_i32_0 = arith.constant 0 : i32
    return %arg0, %c0_i32 : i32, i32
  }
  func.func @transform_1(%arg0: i32) -> (i32, i32) {
    %c0_i32 = arith.constant 0 : i32
    %c0_i32_0 = arith.constant 0 : i32
    %c0_i32_1 = arith.constant 0 : i32
    return %c0_i32, %c0_i32_0 : i32, i32
  }
  func.func @transform_2(%arg0: i32) -> (i32, i32) {
    %c0_i32 = arith.constant 0 : i32
    %c0_i32_0 = arith.constant 0 : i32
    %c0_i32_1 = arith.constant 0 : i32
    return %c0_i32, %c0_i32_0 : i32, i32
  }
  func.func @transform_3(%arg0: i32) -> (i32, i32) {
    %c0_i32 = arith.constant 0 : i32
    %c0_i32_0 = arith.constant 0 : i32
    return %arg0, %c0_i32 : i32, i32
  }
}

module attributes {stable_mosaic.version = 11 : i64} {
  func.func @_lstm_layer_kernel(%arg0: i32, %arg1: memref<16x16xbf16, #tpu.memory_space<vmem>>, %arg2: memref<16x128xbf16, #tpu.memory_space<vmem>>, %arg3: memref<32x128xbf16, #tpu.memory_space<vmem>>, %arg4: memref<1x128xf32, #tpu.memory_space<vmem>>, %arg5: memref<2x32xf32, #tpu.memory_space<vmem>>, %arg6: memref<2x32xf32, #tpu.memory_space<vmem>>, %arg7: memref<8x2x32xbf16, #tpu.memory_space<vmem>>, %arg8: memref<2x32xf32, #tpu.memory_space<vmem>>, %arg9: memref<2x32xf32, #tpu.memory_space<vmem>>, %arg10: memref<2x32xf32, #tpu.memory_space<vmem>>, %arg11: memref<2x32xf32, #tpu.memory_space<vmem>>) attributes {dimension_semantics = [#tpu.dimension_semantics<arbitrary>], iteration_bounds = array<i64: 1>, scalar_prefetch = 0 : i64, scratch_operands = 2 : i64, tpu.core_type = #tpu.core_type<tc>, window_params = [{transform_indices = @transform_0, window_bounds = array<i64: 16, 16>}, {pipeline_mode = #tpu.pipeline_mode<synchronous>, transform_indices = @transform_1, window_bounds = array<i64: 16, 128>}, {pipeline_mode = #tpu.pipeline_mode<synchronous>, transform_indices = @transform_2, window_bounds = array<i64: 32, 128>}, {pipeline_mode = #tpu.pipeline_mode<synchronous>, transform_indices = @transform_3, window_bounds = array<i64: 1, 128>}, {pipeline_mode = #tpu.pipeline_mode<synchronous>, transform_indices = @transform_4, window_bounds = array<i64: 2, 32>}, {pipeline_mode = #tpu.pipeline_mode<synchronous>, transform_indices = @transform_5, window_bounds = array<i64: 2, 32>}, {transform_indices = @transform_6, window_bounds = array<i64: 8, 2, 32>}, {pipeline_mode = #tpu.pipeline_mode<synchronous>, transform_indices = @transform_7, window_bounds = array<i64: 2, 32>}, {pipeline_mode = #tpu.pipeline_mode<synchronous>, transform_indices = @transform_8, window_bounds = array<i64: 2, 32>}]} {
    %c0_i32 = arith.constant 0 : i32
    %0 = arith.cmpi eq, %arg0, %c0_i32 : i32
    %1 = arith.extui %0 : i1 to i32
    %c0_i32_0 = arith.constant 0 : i32
    %2 = arith.cmpi ne, %1, %c0_i32_0 : i32
    scf.if %2 {
      %c0_67 = arith.constant 0 : index
      %c0_68 = arith.constant 0 : index
      %281 = vector.load %arg5[%c0_67, %c0_68] : memref<2x32xf32, #tpu.memory_space<vmem>>, vector<2x32xf32>
      %c0_69 = arith.constant 0 : index
      %c0_70 = arith.constant 0 : index
      %282 = vector.load %arg10[%c0_69, %c0_70] : memref<2x32xf32, #tpu.memory_space<vmem>>, vector<2x32xf32>
      tpu.vector_store %arg10[%c0_69, %c0_70], %281 {strides = array<i32>} : memref<2x32xf32, #tpu.memory_space<vmem>>, vector<2x32xf32>,
      %c0_71 = arith.constant 0 : index
      %c0_72 = arith.constant 0 : index
      %283 = vector.load %arg6[%c0_71, %c0_72] : memref<2x32xf32, #tpu.memory_space<vmem>>, vector<2x32xf32>
      %c0_73 = arith.constant 0 : index
      %c0_74 = arith.constant 0 : index
      %284 = vector.load %arg11[%c0_73, %c0_74] : memref<2x32xf32, #tpu.memory_space<vmem>>, vector<2x32xf32>
      tpu.vector_store %arg11[%c0_73, %c0_74], %283 {strides = array<i32>} : memref<2x32xf32, #tpu.memory_space<vmem>>, vector<2x32xf32>,
    } else {
    }
    %c0 = arith.constant 0 : index
    %c0_1 = arith.constant 0 : index
    %3 = vector.load %arg1[%c0, %c0_1] : memref<16x16xbf16, #tpu.memory_space<vmem>>, vector<16x16xbf16>
    %c0_2 = arith.constant 0 : index
    %c0_3 = arith.constant 0 : index
    %4 = vector.load %arg2[%c0_2, %c0_3] : memref<16x128xbf16, #tpu.memory_space<vmem>>, vector<16x128xbf16>
    %cst = arith.constant dense<0.000000e+00> : vector<16x128xf32>
    %5 = tpu.matmul %3, %4, %cst {dimension_numbers = #tpu.dot_dimension_numbers<[1], [0], [0], [1], [0, 0, 1, 1], [], []>} : vector<16x16xbf16>, vector<16x128xbf16>, vector<16x128xf32> -> vector<16x128xf32>
    %c0_4 = arith.constant 0 : index
    %c0_5 = arith.constant 0 : index
    %6 = vector.load %arg4[%c0_4, %c0_5] : memref<1x128xf32, #tpu.memory_space<vmem>>, vector<1x128xf32>
    %7 = vector.broadcast %6 : vector<1x128xf32> to vector<16x128xf32>
    %8 = arith.addf %5, %7 : vector<16x128xf32>
    %c0_6 = arith.constant 0 : index
    %c0_7 = arith.constant 0 : index
    %9 = vector.load %arg3[%c0_6, %c0_7] : memref<32x128xbf16, #tpu.memory_space<vmem>>, vector<32x128xbf16>
    %c0_8 = arith.constant 0 : index
    %c0_9 = arith.constant 0 : index
    %10 = vector.load %arg10[%c0_8, %c0_9] : memref<2x32xf32, #tpu.memory_space<vmem>>, vector<2x32xf32>
    %c0_10 = arith.constant 0 : index
    %c0_11 = arith.constant 0 : index
    %11 = vector.load %arg11[%c0_10, %c0_11] : memref<2x32xf32, #tpu.memory_space<vmem>>, vector<2x32xf32>
    %12 = vector.extract_strided_slice %8 {offsets = [0, 0], sizes = [2, 128], strides = [1, 1]} : vector<16x128xf32> to vector<2x128xf32>
    %13 = arith.truncf %10 : vector<2x32xf32> to vector<2x32xbf16>
    %cst_12 = arith.constant dense<0.000000e+00> : vector<2x128xf32>
    %14 = tpu.matmul %13, %9, %cst_12 {dimension_numbers = #tpu.dot_dimension_numbers<[1], [0], [0], [1], [0, 0, 1, 1], [], []>} : vector<2x32xbf16>, vector<32x128xbf16>, vector<2x128xf32> -> vector<2x128xf32>
    %15 = arith.addf %12, %14 : vector<2x128xf32>
    %16 = vector.extract_strided_slice %15 {offsets = [0, 0], sizes = [2, 32], strides = [1, 1]} : vector<2x128xf32> to vector<2x32xf32>
    %17 = arith.negf %16 : vector<2x32xf32>
    %18 = math.exp %17 : vector<2x32xf32>
    %cst_13 = arith.constant 1.000000e+00 : f32
    %19 = vector.broadcast %cst_13 : f32 to vector<2x32xf32>
    %20 = arith.addf %19, %18 : vector<2x32xf32>
    %21 = arith.divf %19, %20 : vector<2x32xf32>
    %22 = vector.extract_strided_slice %15 {offsets = [0, 32], sizes = [2, 32], strides = [1, 1]} : vector<2x128xf32> to vector<2x32xf32>
    %23 = arith.negf %22 : vector<2x32xf32>
    %24 = math.exp %23 : vector<2x32xf32>
    %cst_14 = arith.constant 1.000000e+00 : f32
    %25 = vector.broadcast %cst_14 : f32 to vector<2x32xf32>
    %26 = arith.addf %25, %24 : vector<2x32xf32>
    %27 = arith.divf %25, %26 : vector<2x32xf32>
    %28 = vector.extract_strided_slice %15 {offsets = [0, 64], sizes = [2, 32], strides = [1, 1]} : vector<2x128xf32> to vector<2x32xf32>
    %29 = math.tanh %28 : vector<2x32xf32>
    %30 = vector.extract_strided_slice %15 {offsets = [0, 96], sizes = [2, 32], strides = [1, 1]} : vector<2x128xf32> to vector<2x32xf32>
    %31 = arith.negf %30 : vector<2x32xf32>
    %32 = math.exp %31 : vector<2x32xf32>
    %cst_15 = arith.constant 1.000000e+00 : f32
    %33 = vector.broadcast %cst_15 : f32 to vector<2x32xf32>
    %34 = arith.addf %33, %32 : vector<2x32xf32>
    %35 = arith.divf %33, %34 : vector<2x32xf32>
    %36 = arith.mulf %27, %11 : vector<2x32xf32>
    %37 = arith.mulf %21, %29 : vector<2x32xf32>
    %38 = arith.addf %36, %37 : vector<2x32xf32>
    %39 = math.tanh %38 : vector<2x32xf32>
    %40 = arith.mulf %35, %39 : vector<2x32xf32>
    %41 = arith.truncf %40 : vector<2x32xf32> to vector<2x32xbf16>
    %c0_16 = arith.constant 0 : index
    %c0_17 = arith.constant 0 : index
    %c0_18 = arith.constant 0 : index
    %42 = vector.load %arg7[%c0_16, %c0_17, %c0_18] : memref<8x2x32xbf16, #tpu.memory_space<vmem>>, vector<1x2x32xbf16>
    %43 = vector.shape_cast %42 : vector<1x2x32xbf16> to vector<2x32xbf16>
    %44 = vector.shape_cast %41 : vector<2x32xbf16> to vector<1x2x32xbf16>
    tpu.vector_store %arg7[%c0_16, %c0_17, %c0_18], %44 {strides = array<i32>} : memref<8x2x32xbf16, #tpu.memory_space<vmem>>, vector<1x2x32xbf16>,
    %45 = vector.extract_strided_slice %8 {offsets = [2, 0], sizes = [2, 128], strides = [1, 1]} : vector<16x128xf32> to vector<2x128xf32>
    %46 = arith.truncf %40 : vector<2x32xf32> to vector<2x32xbf16>
    %cst_19 = arith.constant dense<0.000000e+00> : vector<2x128xf32>
    %47 = tpu.matmul %46, %9, %cst_19 {dimension_numbers = #tpu.dot_dimension_numbers<[1], [0], [0], [1], [0, 0, 1, 1], [], []>} : vector<2x32xbf16>, vector<32x128xbf16>, vector<2x128xf32> -> vector<2x128xf32>
    %48 = arith.addf %45, %47 : vector<2x128xf32>
    %49 = vector.extract_strided_slice %48 {offsets = [0, 0], sizes = [2, 32], strides = [1, 1]} : vector<2x128xf32> to vector<2x32xf32>
    %50 = arith.negf %49 : vector<2x32xf32>
    %51 = math.exp %50 : vector<2x32xf32>
    %cst_20 = arith.constant 1.000000e+00 : f32
    %52 = vector.broadcast %cst_20 : f32 to vector<2x32xf32>
    %53 = arith.addf %52, %51 : vector<2x32xf32>
    %54 = arith.divf %52, %53 : vector<2x32xf32>
    %55 = vector.extract_strided_slice %48 {offsets = [0, 32], sizes = [2, 32], strides = [1, 1]} : vector<2x128xf32> to vector<2x32xf32>
    %56 = arith.negf %55 : vector<2x32xf32>
    %57 = math.exp %56 : vector<2x32xf32>
    %cst_21 = arith.constant 1.000000e+00 : f32
    %58 = vector.broadcast %cst_21 : f32 to vector<2x32xf32>
    %59 = arith.addf %58, %57 : vector<2x32xf32>
    %60 = arith.divf %58, %59 : vector<2x32xf32>
    %61 = vector.extract_strided_slice %48 {offsets = [0, 64], sizes = [2, 32], strides = [1, 1]} : vector<2x128xf32> to vector<2x32xf32>
    %62 = math.tanh %61 : vector<2x32xf32>
    %63 = vector.extract_strided_slice %48 {offsets = [0, 96], sizes = [2, 32], strides = [1, 1]} : vector<2x128xf32> to vector<2x32xf32>
    %64 = arith.negf %63 : vector<2x32xf32>
    %65 = math.exp %64 : vector<2x32xf32>
    %cst_22 = arith.constant 1.000000e+00 : f32
    %66 = vector.broadcast %cst_22 : f32 to vector<2x32xf32>
    %67 = arith.addf %66, %65 : vector<2x32xf32>
    %68 = arith.divf %66, %67 : vector<2x32xf32>
    %69 = arith.mulf %60, %38 : vector<2x32xf32>
    %70 = arith.mulf %54, %62 : vector<2x32xf32>
    %71 = arith.addf %69, %70 : vector<2x32xf32>
    %72 = math.tanh %71 : vector<2x32xf32>
    %73 = arith.mulf %68, %72 : vector<2x32xf32>
    %74 = arith.truncf %73 : vector<2x32xf32> to vector<2x32xbf16>
    %c1 = arith.constant 1 : index
    %c0_23 = arith.constant 0 : index
    %c0_24 = arith.constant 0 : index
    %75 = vector.load %arg7[%c1, %c0_23, %c0_24] : memref<8x2x32xbf16, #tpu.memory_space<vmem>>, vector<1x2x32xbf16>
    %76 = vector.shape_cast %75 : vector<1x2x32xbf16> to vector<2x32xbf16>
    %77 = vector.shape_cast %74 : vector<2x32xbf16> to vector<1x2x32xbf16>
    tpu.vector_store %arg7[%c1, %c0_23, %c0_24], %77 {strides = array<i32>} : memref<8x2x32xbf16, #tpu.memory_space<vmem>>, vector<1x2x32xbf16>,
    %78 = vector.extract_strided_slice %8 {offsets = [4, 0], sizes = [2, 128], strides = [1, 1]} : vector<16x128xf32> to vector<2x128xf32>
    %79 = arith.truncf %73 : vector<2x32xf32> to vector<2x32xbf16>
    %cst_25 = arith.constant dense<0.000000e+00> : vector<2x128xf32>
    %80 = tpu.matmul %79, %9, %cst_25 {dimension_numbers = #tpu.dot_dimension_numbers<[1], [0], [0], [1], [0, 0, 1, 1], [], []>} : vector<2x32xbf16>, vector<32x128xbf16>, vector<2x128xf32> -> vector<2x128xf32>
    %81 = arith.addf %78, %80 : vector<2x128xf32>
    %82 = vector.extract_strided_slice %81 {offsets = [0, 0], sizes = [2, 32], strides = [1, 1]} : vector<2x128xf32> to vector<2x32xf32>
    %83 = arith.negf %82 : vector<2x32xf32>
    %84 = math.exp %83 : vector<2x32xf32>
    %cst_26 = arith.constant 1.000000e+00 : f32
    %85 = vector.broadcast %cst_26 : f32 to vector<2x32xf32>
    %86 = arith.addf %85, %84 : vector<2x32xf32>
    %87 = arith.divf %85, %86 : vector<2x32xf32>
    %88 = vector.extract_strided_slice %81 {offsets = [0, 32], sizes = [2, 32], strides = [1, 1]} : vector<2x128xf32> to vector<2x32xf32>
    %89 = arith.negf %88 : vector<2x32xf32>
    %90 = math.exp %89 : vector<2x32xf32>
    %cst_27 = arith.constant 1.000000e+00 : f32
    %91 = vector.broadcast %cst_27 : f32 to vector<2x32xf32>
    %92 = arith.addf %91, %90 : vector<2x32xf32>
    %93 = arith.divf %91, %92 : vector<2x32xf32>
    %94 = vector.extract_strided_slice %81 {offsets = [0, 64], sizes = [2, 32], strides = [1, 1]} : vector<2x128xf32> to vector<2x32xf32>
    %95 = math.tanh %94 : vector<2x32xf32>
    %96 = vector.extract_strided_slice %81 {offsets = [0, 96], sizes = [2, 32], strides = [1, 1]} : vector<2x128xf32> to vector<2x32xf32>
    %97 = arith.negf %96 : vector<2x32xf32>
    %98 = math.exp %97 : vector<2x32xf32>
    %cst_28 = arith.constant 1.000000e+00 : f32
    %99 = vector.broadcast %cst_28 : f32 to vector<2x32xf32>
    %100 = arith.addf %99, %98 : vector<2x32xf32>
    %101 = arith.divf %99, %100 : vector<2x32xf32>
    %102 = arith.mulf %93, %71 : vector<2x32xf32>
    %103 = arith.mulf %87, %95 : vector<2x32xf32>
    %104 = arith.addf %102, %103 : vector<2x32xf32>
    %105 = math.tanh %104 : vector<2x32xf32>
    %106 = arith.mulf %101, %105 : vector<2x32xf32>
    %107 = arith.truncf %106 : vector<2x32xf32> to vector<2x32xbf16>
    %c2 = arith.constant 2 : index
    %c0_29 = arith.constant 0 : index
    %c0_30 = arith.constant 0 : index
    %108 = vector.load %arg7[%c2, %c0_29, %c0_30] : memref<8x2x32xbf16, #tpu.memory_space<vmem>>, vector<1x2x32xbf16>
    %109 = vector.shape_cast %108 : vector<1x2x32xbf16> to vector<2x32xbf16>
    %110 = vector.shape_cast %107 : vector<2x32xbf16> to vector<1x2x32xbf16>
    tpu.vector_store %arg7[%c2, %c0_29, %c0_30], %110 {strides = array<i32>} : memref<8x2x32xbf16, #tpu.memory_space<vmem>>, vector<1x2x32xbf16>,
    %111 = vector.extract_strided_slice %8 {offsets = [6, 0], sizes = [2, 128], strides = [1, 1]} : vector<16x128xf32> to vector<2x128xf32>
    %112 = arith.truncf %106 : vector<2x32xf32> to vector<2x32xbf16>
    %cst_31 = arith.constant dense<0.000000e+00> : vector<2x128xf32>
    %113 = tpu.matmul %112, %9, %cst_31 {dimension_numbers = #tpu.dot_dimension_numbers<[1], [0], [0], [1], [0, 0, 1, 1], [], []>} : vector<2x32xbf16>, vector<32x128xbf16>, vector<2x128xf32> -> vector<2x128xf32>
    %114 = arith.addf %111, %113 : vector<2x128xf32>
    %115 = vector.extract_strided_slice %114 {offsets = [0, 0], sizes = [2, 32], strides = [1, 1]} : vector<2x128xf32> to vector<2x32xf32>
    %116 = arith.negf %115 : vector<2x32xf32>
    %117 = math.exp %116 : vector<2x32xf32>
    %cst_32 = arith.constant 1.000000e+00 : f32
    %118 = vector.broadcast %cst_32 : f32 to vector<2x32xf32>
    %119 = arith.addf %118, %117 : vector<2x32xf32>
    %120 = arith.divf %118, %119 : vector<2x32xf32>
    %121 = vector.extract_strided_slice %114 {offsets = [0, 32], sizes = [2, 32], strides = [1, 1]} : vector<2x128xf32> to vector<2x32xf32>
    %122 = arith.negf %121 : vector<2x32xf32>
    %123 = math.exp %122 : vector<2x32xf32>
    %cst_33 = arith.constant 1.000000e+00 : f32
    %124 = vector.broadcast %cst_33 : f32 to vector<2x32xf32>
    %125 = arith.addf %124, %123 : vector<2x32xf32>
    %126 = arith.divf %124, %125 : vector<2x32xf32>
    %127 = vector.extract_strided_slice %114 {offsets = [0, 64], sizes = [2, 32], strides = [1, 1]} : vector<2x128xf32> to vector<2x32xf32>
    %128 = math.tanh %127 : vector<2x32xf32>
    %129 = vector.extract_strided_slice %114 {offsets = [0, 96], sizes = [2, 32], strides = [1, 1]} : vector<2x128xf32> to vector<2x32xf32>
    %130 = arith.negf %129 : vector<2x32xf32>
    %131 = math.exp %130 : vector<2x32xf32>
    %cst_34 = arith.constant 1.000000e+00 : f32
    %132 = vector.broadcast %cst_34 : f32 to vector<2x32xf32>
    %133 = arith.addf %132, %131 : vector<2x32xf32>
    %134 = arith.divf %132, %133 : vector<2x32xf32>
    %135 = arith.mulf %126, %104 : vector<2x32xf32>
    %136 = arith.mulf %120, %128 : vector<2x32xf32>
    %137 = arith.addf %135, %136 : vector<2x32xf32>
    %138 = math.tanh %137 : vector<2x32xf32>
    %139 = arith.mulf %134, %138 : vector<2x32xf32>
    %140 = arith.truncf %139 : vector<2x32xf32> to vector<2x32xbf16>
    %c3 = arith.constant 3 : index
    %c0_35 = arith.constant 0 : index
    %c0_36 = arith.constant 0 : index
    %141 = vector.load %arg7[%c3, %c0_35, %c0_36] : memref<8x2x32xbf16, #tpu.memory_space<vmem>>, vector<1x2x32xbf16>
    %142 = vector.shape_cast %141 : vector<1x2x32xbf16> to vector<2x32xbf16>
    %143 = vector.shape_cast %140 : vector<2x32xbf16> to vector<1x2x32xbf16>
    tpu.vector_store %arg7[%c3, %c0_35, %c0_36], %143 {strides = array<i32>} : memref<8x2x32xbf16, #tpu.memory_space<vmem>>, vector<1x2x32xbf16>,
    %144 = vector.extract_strided_slice %8 {offsets = [8, 0], sizes = [2, 128], strides = [1, 1]} : vector<16x128xf32> to vector<2x128xf32>
    %145 = arith.truncf %139 : vector<2x32xf32> to vector<2x32xbf16>
    %cst_37 = arith.constant dense<0.000000e+00> : vector<2x128xf32>
    %146 = tpu.matmul %145, %9, %cst_37 {dimension_numbers = #tpu.dot_dimension_numbers<[1], [0], [0], [1], [0, 0, 1, 1], [], []>} : vector<2x32xbf16>, vector<32x128xbf16>, vector<2x128xf32> -> vector<2x128xf32>
    %147 = arith.addf %144, %146 : vector<2x128xf32>
    %148 = vector.extract_strided_slice %147 {offsets = [0, 0], sizes = [2, 32], strides = [1, 1]} : vector<2x128xf32> to vector<2x32xf32>
    %149 = arith.negf %148 : vector<2x32xf32>
    %150 = math.exp %149 : vector<2x32xf32>
    %cst_38 = arith.constant 1.000000e+00 : f32
    %151 = vector.broadcast %cst_38 : f32 to vector<2x32xf32>
    %152 = arith.addf %151, %150 : vector<2x32xf32>
    %153 = arith.divf %151, %152 : vector<2x32xf32>
    %154 = vector.extract_strided_slice %147 {offsets = [0, 32], sizes = [2, 32], strides = [1, 1]} : vector<2x128xf32> to vector<2x32xf32>
    %155 = arith.negf %154 : vector<2x32xf32>
    %156 = math.exp %155 : vector<2x32xf32>
    %cst_39 = arith.constant 1.000000e+00 : f32
    %157 = vector.broadcast %cst_39 : f32 to vector<2x32xf32>
    %158 = arith.addf %157, %156 : vector<2x32xf32>
    %159 = arith.divf %157, %158 : vector<2x32xf32>
    %160 = vector.extract_strided_slice %147 {offsets = [0, 64], sizes = [2, 32], strides = [1, 1]} : vector<2x128xf32> to vector<2x32xf32>
    %161 = math.tanh %160 : vector<2x32xf32>
    %162 = vector.extract_strided_slice %147 {offsets = [0, 96], sizes = [2, 32], strides = [1, 1]} : vector<2x128xf32> to vector<2x32xf32>
    %163 = arith.negf %162 : vector<2x32xf32>
    %164 = math.exp %163 : vector<2x32xf32>
    %cst_40 = arith.constant 1.000000e+00 : f32
    %165 = vector.broadcast %cst_40 : f32 to vector<2x32xf32>
    %166 = arith.addf %165, %164 : vector<2x32xf32>
    %167 = arith.divf %165, %166 : vector<2x32xf32>
    %168 = arith.mulf %159, %137 : vector<2x32xf32>
    %169 = arith.mulf %153, %161 : vector<2x32xf32>
    %170 = arith.addf %168, %169 : vector<2x32xf32>
    %171 = math.tanh %170 : vector<2x32xf32>
    %172 = arith.mulf %167, %171 : vector<2x32xf32>
    %173 = arith.truncf %172 : vector<2x32xf32> to vector<2x32xbf16>
    %c4 = arith.constant 4 : index
    %c0_41 = arith.constant 0 : index
    %c0_42 = arith.constant 0 : index
    %174 = vector.load %arg7[%c4, %c0_41, %c0_42] : memref<8x2x32xbf16, #tpu.memory_space<vmem>>, vector<1x2x32xbf16>
    %175 = vector.shape_cast %174 : vector<1x2x32xbf16> to vector<2x32xbf16>
    %176 = vector.shape_cast %173 : vector<2x32xbf16> to vector<1x2x32xbf16>
    tpu.vector_store %arg7[%c4, %c0_41, %c0_42], %176 {strides = array<i32>} : memref<8x2x32xbf16, #tpu.memory_space<vmem>>, vector<1x2x32xbf16>,
    %177 = vector.extract_strided_slice %8 {offsets = [10, 0], sizes = [2, 128], strides = [1, 1]} : vector<16x128xf32> to vector<2x128xf32>
    %178 = arith.truncf %172 : vector<2x32xf32> to vector<2x32xbf16>
    %cst_43 = arith.constant dense<0.000000e+00> : vector<2x128xf32>
    %179 = tpu.matmul %178, %9, %cst_43 {dimension_numbers = #tpu.dot_dimension_numbers<[1], [0], [0], [1], [0, 0, 1, 1], [], []>} : vector<2x32xbf16>, vector<32x128xbf16>, vector<2x128xf32> -> vector<2x128xf32>
    %180 = arith.addf %177, %179 : vector<2x128xf32>
    %181 = vector.extract_strided_slice %180 {offsets = [0, 0], sizes = [2, 32], strides = [1, 1]} : vector<2x128xf32> to vector<2x32xf32>
    %182 = arith.negf %181 : vector<2x32xf32>
    %183 = math.exp %182 : vector<2x32xf32>
    %cst_44 = arith.constant 1.000000e+00 : f32
    %184 = vector.broadcast %cst_44 : f32 to vector<2x32xf32>
    %185 = arith.addf %184, %183 : vector<2x32xf32>
    %186 = arith.divf %184, %185 : vector<2x32xf32>
    %187 = vector.extract_strided_slice %180 {offsets = [0, 32], sizes = [2, 32], strides = [1, 1]} : vector<2x128xf32> to vector<2x32xf32>
    %188 = arith.negf %187 : vector<2x32xf32>
    %189 = math.exp %188 : vector<2x32xf32>
    %cst_45 = arith.constant 1.000000e+00 : f32
    %190 = vector.broadcast %cst_45 : f32 to vector<2x32xf32>
    %191 = arith.addf %190, %189 : vector<2x32xf32>
    %192 = arith.divf %190, %191 : vector<2x32xf32>
    %193 = vector.extract_strided_slice %180 {offsets = [0, 64], sizes = [2, 32], strides = [1, 1]} : vector<2x128xf32> to vector<2x32xf32>
    %194 = math.tanh %193 : vector<2x32xf32>
    %195 = vector.extract_strided_slice %180 {offsets = [0, 96], sizes = [2, 32], strides = [1, 1]} : vector<2x128xf32> to vector<2x32xf32>
    %196 = arith.negf %195 : vector<2x32xf32>
    %197 = math.exp %196 : vector<2x32xf32>
    %cst_46 = arith.constant 1.000000e+00 : f32
    %198 = vector.broadcast %cst_46 : f32 to vector<2x32xf32>
    %199 = arith.addf %198, %197 : vector<2x32xf32>
    %200 = arith.divf %198, %199 : vector<2x32xf32>
    %201 = arith.mulf %192, %170 : vector<2x32xf32>
    %202 = arith.mulf %186, %194 : vector<2x32xf32>
    %203 = arith.addf %201, %202 : vector<2x32xf32>
    %204 = math.tanh %203 : vector<2x32xf32>
    %205 = arith.mulf %200, %204 : vector<2x32xf32>
    %206 = arith.truncf %205 : vector<2x32xf32> to vector<2x32xbf16>
    %c5 = arith.constant 5 : index
    %c0_47 = arith.constant 0 : index
    %c0_48 = arith.constant 0 : index
    %207 = vector.load %arg7[%c5, %c0_47, %c0_48] : memref<8x2x32xbf16, #tpu.memory_space<vmem>>, vector<1x2x32xbf16>
    %208 = vector.shape_cast %207 : vector<1x2x32xbf16> to vector<2x32xbf16>
    %209 = vector.shape_cast %206 : vector<2x32xbf16> to vector<1x2x32xbf16>
    tpu.vector_store %arg7[%c5, %c0_47, %c0_48], %209 {strides = array<i32>} : memref<8x2x32xbf16, #tpu.memory_space<vmem>>, vector<1x2x32xbf16>,
    %210 = vector.extract_strided_slice %8 {offsets = [12, 0], sizes = [2, 128], strides = [1, 1]} : vector<16x128xf32> to vector<2x128xf32>
    %211 = arith.truncf %205 : vector<2x32xf32> to vector<2x32xbf16>
    %cst_49 = arith.constant dense<0.000000e+00> : vector<2x128xf32>
    %212 = tpu.matmul %211, %9, %cst_49 {dimension_numbers = #tpu.dot_dimension_numbers<[1], [0], [0], [1], [0, 0, 1, 1], [], []>} : vector<2x32xbf16>, vector<32x128xbf16>, vector<2x128xf32> -> vector<2x128xf32>
    %213 = arith.addf %210, %212 : vector<2x128xf32>
    %214 = vector.extract_strided_slice %213 {offsets = [0, 0], sizes = [2, 32], strides = [1, 1]} : vector<2x128xf32> to vector<2x32xf32>
    %215 = arith.negf %214 : vector<2x32xf32>
    %216 = math.exp %215 : vector<2x32xf32>
    %cst_50 = arith.constant 1.000000e+00 : f32
    %217 = vector.broadcast %cst_50 : f32 to vector<2x32xf32>
    %218 = arith.addf %217, %216 : vector<2x32xf32>
    %219 = arith.divf %217, %218 : vector<2x32xf32>
    %220 = vector.extract_strided_slice %213 {offsets = [0, 32], sizes = [2, 32], strides = [1, 1]} : vector<2x128xf32> to vector<2x32xf32>
    %221 = arith.negf %220 : vector<2x32xf32>
    %222 = math.exp %221 : vector<2x32xf32>
    %cst_51 = arith.constant 1.000000e+00 : f32
    %223 = vector.broadcast %cst_51 : f32 to vector<2x32xf32>
    %224 = arith.addf %223, %222 : vector<2x32xf32>
    %225 = arith.divf %223, %224 : vector<2x32xf32>
    %226 = vector.extract_strided_slice %213 {offsets = [0, 64], sizes = [2, 32], strides = [1, 1]} : vector<2x128xf32> to vector<2x32xf32>
    %227 = math.tanh %226 : vector<2x32xf32>
    %228 = vector.extract_strided_slice %213 {offsets = [0, 96], sizes = [2, 32], strides = [1, 1]} : vector<2x128xf32> to vector<2x32xf32>
    %229 = arith.negf %228 : vector<2x32xf32>
    %230 = math.exp %229 : vector<2x32xf32>
    %cst_52 = arith.constant 1.000000e+00 : f32
    %231 = vector.broadcast %cst_52 : f32 to vector<2x32xf32>
    %232 = arith.addf %231, %230 : vector<2x32xf32>
    %233 = arith.divf %231, %232 : vector<2x32xf32>
    %234 = arith.mulf %225, %203 : vector<2x32xf32>
    %235 = arith.mulf %219, %227 : vector<2x32xf32>
    %236 = arith.addf %234, %235 : vector<2x32xf32>
    %237 = math.tanh %236 : vector<2x32xf32>
    %238 = arith.mulf %233, %237 : vector<2x32xf32>
    %239 = arith.truncf %238 : vector<2x32xf32> to vector<2x32xbf16>
    %c6 = arith.constant 6 : index
    %c0_53 = arith.constant 0 : index
    %c0_54 = arith.constant 0 : index
    %240 = vector.load %arg7[%c6, %c0_53, %c0_54] : memref<8x2x32xbf16, #tpu.memory_space<vmem>>, vector<1x2x32xbf16>
    %241 = vector.shape_cast %240 : vector<1x2x32xbf16> to vector<2x32xbf16>
    %242 = vector.shape_cast %239 : vector<2x32xbf16> to vector<1x2x32xbf16>
    tpu.vector_store %arg7[%c6, %c0_53, %c0_54], %242 {strides = array<i32>} : memref<8x2x32xbf16, #tpu.memory_space<vmem>>, vector<1x2x32xbf16>,
    %243 = vector.extract_strided_slice %8 {offsets = [14, 0], sizes = [2, 128], strides = [1, 1]} : vector<16x128xf32> to vector<2x128xf32>
    %244 = arith.truncf %238 : vector<2x32xf32> to vector<2x32xbf16>
    %cst_55 = arith.constant dense<0.000000e+00> : vector<2x128xf32>
    %245 = tpu.matmul %244, %9, %cst_55 {dimension_numbers = #tpu.dot_dimension_numbers<[1], [0], [0], [1], [0, 0, 1, 1], [], []>} : vector<2x32xbf16>, vector<32x128xbf16>, vector<2x128xf32> -> vector<2x128xf32>
    %246 = arith.addf %243, %245 : vector<2x128xf32>
    %247 = vector.extract_strided_slice %246 {offsets = [0, 0], sizes = [2, 32], strides = [1, 1]} : vector<2x128xf32> to vector<2x32xf32>
    %248 = arith.negf %247 : vector<2x32xf32>
    %249 = math.exp %248 : vector<2x32xf32>
    %cst_56 = arith.constant 1.000000e+00 : f32
    %250 = vector.broadcast %cst_56 : f32 to vector<2x32xf32>
    %251 = arith.addf %250, %249 : vector<2x32xf32>
    %252 = arith.divf %250, %251 : vector<2x32xf32>
    %253 = vector.extract_strided_slice %246 {offsets = [0, 32], sizes = [2, 32], strides = [1, 1]} : vector<2x128xf32> to vector<2x32xf32>
    %254 = arith.negf %253 : vector<2x32xf32>
    %255 = math.exp %254 : vector<2x32xf32>
    %cst_57 = arith.constant 1.000000e+00 : f32
    %256 = vector.broadcast %cst_57 : f32 to vector<2x32xf32>
    %257 = arith.addf %256, %255 : vector<2x32xf32>
    %258 = arith.divf %256, %257 : vector<2x32xf32>
    %259 = vector.extract_strided_slice %246 {offsets = [0, 64], sizes = [2, 32], strides = [1, 1]} : vector<2x128xf32> to vector<2x32xf32>
    %260 = math.tanh %259 : vector<2x32xf32>
    %261 = vector.extract_strided_slice %246 {offsets = [0, 96], sizes = [2, 32], strides = [1, 1]} : vector<2x128xf32> to vector<2x32xf32>
    %262 = arith.negf %261 : vector<2x32xf32>
    %263 = math.exp %262 : vector<2x32xf32>
    %cst_58 = arith.constant 1.000000e+00 : f32
    %264 = vector.broadcast %cst_58 : f32 to vector<2x32xf32>
    %265 = arith.addf %264, %263 : vector<2x32xf32>
    %266 = arith.divf %264, %265 : vector<2x32xf32>
    %267 = arith.mulf %258, %236 : vector<2x32xf32>
    %268 = arith.mulf %252, %260 : vector<2x32xf32>
    %269 = arith.addf %267, %268 : vector<2x32xf32>
    %270 = math.tanh %269 : vector<2x32xf32>
    %271 = arith.mulf %266, %270 : vector<2x32xf32>
    %272 = arith.truncf %271 : vector<2x32xf32> to vector<2x32xbf16>
    %c7 = arith.constant 7 : index
    %c0_59 = arith.constant 0 : index
    %c0_60 = arith.constant 0 : index
    %273 = vector.load %arg7[%c7, %c0_59, %c0_60] : memref<8x2x32xbf16, #tpu.memory_space<vmem>>, vector<1x2x32xbf16>
    %274 = vector.shape_cast %273 : vector<1x2x32xbf16> to vector<2x32xbf16>
    %275 = vector.shape_cast %272 : vector<2x32xbf16> to vector<1x2x32xbf16>
    tpu.vector_store %arg7[%c7, %c0_59, %c0_60], %275 {strides = array<i32>} : memref<8x2x32xbf16, #tpu.memory_space<vmem>>, vector<1x2x32xbf16>,
    %c0_61 = arith.constant 0 : index
    %c0_62 = arith.constant 0 : index
    %276 = vector.load %arg10[%c0_61, %c0_62] : memref<2x32xf32, #tpu.memory_space<vmem>>, vector<2x32xf32>
    tpu.vector_store %arg10[%c0_61, %c0_62], %271 {strides = array<i32>} : memref<2x32xf32, #tpu.memory_space<vmem>>, vector<2x32xf32>,
    %c0_63 = arith.constant 0 : index
    %c0_64 = arith.constant 0 : index
    %277 = vector.load %arg11[%c0_63, %c0_64] : memref<2x32xf32, #tpu.memory_space<vmem>>, vector<2x32xf32>
    tpu.vector_store %arg11[%c0_63, %c0_64], %269 {strides = array<i32>} : memref<2x32xf32, #tpu.memory_space<vmem>>, vector<2x32xf32>,
    %c0_i32_65 = arith.constant 0 : i32
    %278 = arith.cmpi eq, %arg0, %c0_i32_65 : i32
    %279 = arith.extui %278 : i1 to i32
    %c0_i32_66 = arith.constant 0 : i32
    %280 = arith.cmpi ne, %279, %c0_i32_66 : i32
    scf.if %280 {
      %c0_67 = arith.constant 0 : index
      %c0_68 = arith.constant 0 : index
      %281 = vector.load %arg8[%c0_67, %c0_68] : memref<2x32xf32, #tpu.memory_space<vmem>>, vector<2x32xf32>
      tpu.vector_store %arg8[%c0_67, %c0_68], %271 {strides = array<i32>} : memref<2x32xf32, #tpu.memory_space<vmem>>, vector<2x32xf32>,
      %c0_69 = arith.constant 0 : index
      %c0_70 = arith.constant 0 : index
      %282 = vector.load %arg9[%c0_69, %c0_70] : memref<2x32xf32, #tpu.memory_space<vmem>>, vector<2x32xf32>
      tpu.vector_store %arg9[%c0_69, %c0_70], %269 {strides = array<i32>} : memref<2x32xf32, #tpu.memory_space<vmem>>, vector<2x32xf32>,
    } else {
    }
    return
  }
  func.func @transform_0(%arg0: i32) -> (i32, i32) {
    %c0_i32 = arith.constant 0 : i32
    %c0_i32_0 = arith.constant 0 : i32
    return %arg0, %c0_i32 : i32, i32
  }
  func.func @transform_1(%arg0: i32) -> (i32, i32) {
    %c0_i32 = arith.constant 0 : i32
    %c0_i32_0 = arith.constant 0 : i32
    %c0_i32_1 = arith.constant 0 : i32
    return %c0_i32, %c0_i32_0 : i32, i32
  }
  func.func @transform_2(%arg0: i32) -> (i32, i32) {
    %c0_i32 = arith.constant 0 : i32
    %c0_i32_0 = arith.constant 0 : i32
    %c0_i32_1 = arith.constant 0 : i32
    return %c0_i32, %c0_i32_0 : i32, i32
  }
  func.func @transform_3(%arg0: i32) -> (i32, i32) {
    %c0_i32 = arith.constant 0 : i32
    %c0_i32_0 = arith.constant 0 : i32
    %c0_i32_1 = arith.constant 0 : i32
    return %c0_i32, %c0_i32_0 : i32, i32
  }
  func.func @transform_4(%arg0: i32) -> (i32, i32) {
    %c0_i32 = arith.constant 0 : i32
    %c0_i32_0 = arith.constant 0 : i32
    %c0_i32_1 = arith.constant 0 : i32
    return %c0_i32, %c0_i32_0 : i32, i32
  }
  func.func @transform_5(%arg0: i32) -> (i32, i32) {
    %c0_i32 = arith.constant 0 : i32
    %c0_i32_0 = arith.constant 0 : i32
    %c0_i32_1 = arith.constant 0 : i32
    return %c0_i32, %c0_i32_0 : i32, i32
  }
  func.func @transform_6(%arg0: i32) -> (i32, i32, i32) {
    %c0_i32 = arith.constant 0 : i32
    %c0_i32_0 = arith.constant 0 : i32
    %c0_i32_1 = arith.constant 0 : i32
    return %arg0, %c0_i32, %c0_i32_0 : i32, i32, i32
  }
  func.func @transform_7(%arg0: i32) -> (i32, i32) {
    %c0_i32 = arith.constant 0 : i32
    %c0_i32_0 = arith.constant 0 : i32
    %c0_i32_1 = arith.constant 0 : i32
    return %c0_i32, %c0_i32_0 : i32, i32
  }
  func.func @transform_8(%arg0: i32) -> (i32, i32) {
    %c0_i32 = arith.constant 0 : i32
    %c0_i32_0 = arith.constant 0 : i32
    %c0_i32_1 = arith.constant 0 : i32
    return %c0_i32, %c0_i32_0 : i32, i32
  }
}

</mosaic_0001>

<bundles_post_ra>
// kernel: mol_lstm_forward.5
= control target key start
LH: loop header
LB: loop body
LE: loop exit
PB: predicated region body
PF: predicated region fallthrough
CT: control target
= control target key end

     0   :  { %v150_v0 = vmov 0.0   ;;  %vm151_vm0 = vmmov 0   ;;  %vm45_vm1 = vcmask 261120   ;;  %vm90_vm2 = vcmask 392192   ;;  %s196_s1 = inlined_call_operand.vmem [shape: bf16[32,48], index: 1, kind: input, shape index: {}]   ;;  %s197_s0 = inlined_call_operand.vmem [shape: bf16[16,32], index: 0, kind: input, shape index: {}]   ;;  %s198_s2 = inlined_call_operand.vmem [shape: f32[1,48], index: 2, kind: input, shape index: {}]   ;;  %s199_s3 = inlined_call_operand.vmem [shape: f32[16,48], index: 3, kind: output, shape index: {}]  }
   0x1   :  { %129 = vmatprep.subr.bf16.mxu0 %v150_v0  ;;  %v139_v1 = vld [vmem:[%s196_s1 + $0x8] sm:$0xff]   ;;  %133 = vmatprep.mubr.msk.bf16.mxu0 %vm151_vm0, %v150_v0  ;;  %v140_v2 = vld [vmem:[%s196_s1] sm:$0xff]  }
   0x2   :  { %130 = vmatpush3.bf16.msra.mxu0 %v139_v1  ;;  %v141_v3 = vld [vmem:[%s197_s0] sm:$0xff]  }
   0x3   :  { %131 = vmatprep.subr.bf16.mxu0 %v150_v0  ;;  %v121_v4 = vld [vmem:[%s198_s2] ss:$0 sm:$0xff] }
   0x6   :  { %132 = vmatpush3.bf16.msra.mxu0 %v140_v2 }
   0x9   :  { %134 = vmatmul.mubr.msk.bf16.vlgmr.msra.gmra.mxu0 %vm45_vm1, %v141_v3 }
  0xc9   :  { %v83_v5 = vpop.f32.mrf.mxu0 }
  0xca   :  { %v84_v6 = vadd.f32 %v121_v4, %v83_v5 }
  0xcb   :  { %v135_v7 = vpop.f32.mrf.mxu0 }
  0xcc   :  { %v91_v8 = vsel %vm90_vm2, %v84_v6, -inf }
  0xcd   :  { %92 = vmax.xlane.f32.xlu0 %v91_v8  ;;  %v86_v9 = vpop.f32.mrf.mxu0 }
  0xce   :  { %v87_v10 = vadd.f32 %v121_v4, %v86_v9 }
  0xcf   :  { %v136_v11 = vpop.f32.mrf.mxu0 }
  0xd0   :  { %v94_v12 = vsel %vm90_vm2, %v87_v10, -inf }
  0xd1   :  { %95 = vmax.xlane.f32.xlu0 %v94_v12 }
 0x156   :  { %v93_v13 = vpop.xlane.xlu0 %92 }
 0x157   :  { %v97_v14 = vsub.f32 %v84_v6, %v93_v13 }
 0x159   :  { %v99_v15 = vmul.f32 1.442695, %v97_v14 }
 0x15a   :  { %v96_v16 = vpop.xlane.xlu0 %95 }
 0x15b   :  { %142 = vpow2.f32 %v99_v15  ;;  %v98_v17 = vsub.f32 %v87_v10, %v96_v16 }
 0x15d   :  { %v101_v18 = vmul.f32 1.442695, %v98_v17 }
 0x15f   :  { %144 = vpow2.f32 %v101_v18 }
 0x168   :  { %v143_v19 = vpop.eup %142 }
 0x169   :  { %v103_v20 = vsel %vm90_vm2, %v143_v19, 0.0 }
 0x16a   :  { %104 = vadd.xlane.f32.xlu1 %v103_v20 }
 0x16c   :  { %v145_v21 = vpop.eup %144 }
 0x16d   :  { %v106_v22 = vsel %vm90_vm2, %v145_v21, 0.0 }
 0x16e   :  { %107 = vadd.xlane.f32.xlu1 %v106_v22 }
 0x1f3   :  { %v105_v23 = vpop.xlane.xlu1 %104 }
 0x1f4   :  { %146 = vlog2.f32 %v105_v23 }
 0x1f7   :  { %v108_v24 = vpop.xlane.xlu1 %107 }
 0x1f8   :  { %148 = vlog2.f32 %v108_v24 }
 0x201   :  { %v147_v25 = vpop.eup %146 }
 0x202   :  { %v110_v26 = vmul.f32 0.6931472, %v147_v25 }
 0x204   :  { %v113_v27 = vsub.f32 %v97_v14, %v110_v26 }
 0x205   :  { %v149_v28 = vpop.eup %148 }
 0x206   :  { %115 = vst.msk [vmem:[%s199_s3] sm:$0xff] %vm90_vm2, %v113_v27  ;;  %v112_v29 = vmul.f32 0.6931472, %v149_v28 }
 0x208   :  { %v114_v30 = vsub.f32 %v98_v17, %v112_v29 }
 0x20a   :  { %116 = vst.msk [vmem:[%s199_s3 + $0x8] sm:$0xff] %vm90_vm2, %v114_v30 }

// kernel: mol_lstm_forward.4
= control target key start
LH: loop header
LB: loop body
LE: loop exit
PB: predicated region body
PF: predicated region fallthrough
CT: control target
= control target key end

     0   :  { %v1144_v0 = vmov 0.0   ;;  %vm1145_vm0 = vmmov 0   ;;  %vm32_vm1 = vcmask 254976   ;;  %vm66_vm2 = vcmask 261120   ;;  %s1149_s9 = smov 96   ;;  %s1401_s1 = inlined_call_operand.vmem [shape: bf16[32,128], index: 1, kind: input, shape index: {}]   ;;  %s1402_s2 = inlined_call_operand.vmem [shape: bf16[32,128], index: 2, kind: input, shape index: {}]   ;;  %s1403_s0 = inlined_call_operand.vmem [shape: bf16[16,32], index: 0, kind: input, shape index: {}]   ;;  %s1404_s4 = inlined_call_operand.vmem [shape: f32[2,32], index: 4, kind: input, shape index: {}, may-alias: {4,5}]   ;;  %s1405_s5 = inlined_call_operand.vmem [shape: f32[2,32], index: 5, kind: input, shape index: {}, may-alias: {4,5}]   ;;  %s1406_s3 = inlined_call_operand.vmem [shape: f32[1,128], index: 3, kind: input, shape index: {}]   ;;  %s1407_s6 = inlined_call_operand.vmem [shape: bf16[8,2,32], index: 6, kind: output, shape index: {0}]   ;;  %s1408_s7 = inlined_call_operand.vmem [shape: f32[2,32], index: 7, kind: output, shape index: {1}]   ;;  %s1409_s8 = inlined_call_operand.vmem [shape: f32[2,32], index: 8, kind: output, shape index: {2}]  }
   0x1   :  { %997 = vmatprep.subr.bf16.mxu0 %v1144_v0  ;;  %v1075_v1 = vld [vmem:[%s1401_s1 + $0x8] sm:$0xff]   ;;  %1005 = vmatprep.subr.bf16.mxu1 %v1144_v0  ;;  %v1077_v3 = vld [vmem:[%s1401_s1] sm:$0xff]   ;;  %vm221_vm3 = vcmask 253952   ;;  %vm916_vm4 = vcmask 261126  }
   0x2   :  { %v1203_v2 = vld [vmem:[%s1402_s2 + $0x8] sm:$0xff]   ;;  %1001 = vmatprep.mubr.msk.bf16.mxu0 %vm1145_vm0, %v1144_v0  ;;  %1009 = vmatprep.mubr.msk.bf16.mxu1 %vm1145_vm0, %v1144_v0  ;;  %v1217_v4 = vld [vmem:[%s1402_s2] sm:$0xff]  }
   0x3   :  { %998 = vmatpush3.bf16.msra.mxu0 %v1075_v1  ;;  %1006 = vmatpush3.bf16.msra.mxu1 %v1203_v2  ;;  %v1079_v5 = vld [vmem:[%s1403_s0] sm:$0xff]  }
   0x4   :  { %999 = vmatprep.subr.bf16.mxu0 %v1144_v0  ;;  %1007 = vmatprep.subr.bf16.mxu1 %v1144_v0  ;;  %v31_v6 = vld [vmem:[%s1404_s4] sm:$0x3] }
   0x5   :  { %33 = vst.msk [vmem:[#allocation2] sm:$0x3] %vm32_vm1, %v31_v6  ;;  %v34_v9 = vld [vmem:[%s1405_s5] sm:$0x3]  ;;  %s1146_s5 = smov 64  }
   0x6   :  { %35 = vst.msk [vmem:[#allocation3] sm:$0x3] %vm32_vm1, %v34_v9  ;;  %v940_v11 = vld [vmem:[%s1406_s3] ss:$0 sm:$0xff]  ;;  %s1147_s3 = smov 32  }
   0x7   :  { %1000 = vmatpush3.bf16.msra.mxu0 %v1077_v3  ;;  %1008 = vmatpush3.bf16.msra.mxu1 %v1217_v4 }
   0x8   :  { %1013 = vmatprep.subr.bf16.mxu0 %v1144_v0  ;;  %1021 = vmatprep.subr.bf16.mxu1 %v1144_v0 }
   0xa   :  { %1002 = vmatmul.mubr.msk.bf16.vlgmr.msra.gmra.mxu0 %vm66_vm2, %v1079_v5 }
   0xb   :  { %1014 = vmatpush3.bf16.msra.mxu0 %v1203_v2  ;;  %1017 = vmatprep.mubr.msk.bf16.mxu0 %vm1145_vm0, %v1144_v0 }
   0xc   :  { %1015 = vmatprep.subr.bf16.mxu0 %v1144_v0  ;;  %v115_v7 = vld [vmem:[#allocation2] sm:$0x3] }
   0xd   :  { %v117_v8 = vpack.c.bf16 %v115_v7, %v115_v7  ;;  %v116_v23 = vld [vmem:[#allocation3] sm:$0x3] }
   0xf   :  { %1016 = vmatpush3.bf16.msra.mxu0 %v1217_v4  ;;  %1010 = vmatmul.mubr.msk.bf16.vlgmr.msra.gmra.mxu1 %vm66_vm2, %v117_v8 }
  0x10   :  { %1029 = vmatprep.subr.bf16.mxu0 %v1144_v0  ;;  %1022 = vmatpush3.bf16.msra.mxu1 %v1203_v2 }
  0x11   :  { %1025 = vmatprep.mubr.msk.bf16.mxu1 %vm1145_vm0, %v1144_v0  ;;  %1023 = vmatprep.subr.bf16.mxu1 %v1144_v0 }
  0x14   :  { %1024 = vmatpush3.bf16.msra.mxu1 %v1217_v4 }
  0x15   :  { %1037 = vmatprep.subr.bf16.mxu1 %v1144_v0 }
  0xca   :  { %v104_v10 = vpop.f32.mrf.mxu0 }
  0xcb   :  { %v1251_v13 = vadd.f32 %v940_v11, %v104_v10 }
  0xcc   :  { %v1003_v12 = vpop.f32.mrf.mxu0 }
  0xce   :  { %v107_v14 = vpop.f32.mrf.mxu0 }
  0xcf   :  { %v1253_v15 = vadd.f32 %v940_v11, %v107_v14  ;;  %v167_v17 = vpop.f32.mrf.mxu1 }
  0xd0   :  { %v1004_v16 = vpop.f32.mrf.mxu0  ;;  %v173_v18 = vadd.f32 %v167_v17, %v1251_v13 }
  0xd1   :  { %v1011_v19 = vpop.f32.mrf.mxu1 }
  0xd2   :  { %1080 = vtanh.f32 %v173_v18  ;;  %v948_v24 = vmul.f32 -1.442695, %v173_v18 }
  0xd3   :  { %v170_v20 = vpop.f32.mrf.mxu1 }
  0xd4   :  { %1082 = vpow2.f32 %v948_v24 }
  0xd5   :  { %v1012_v21 = vpop.f32.mrf.mxu1 }
  0xdf   :  { %v1081_v22 = vpop.eup %1080 }
  0xe0   :  { %187 = vrot.lane.b32.xlu0 %v1081_v22, %s1146_s5 }
  0xe1   :  { %v1083_v25 = vpop.eup %1082 }
  0xe2   :  { %v177_v26 = vadd.f32 1.0, %v1083_v25 }
  0xe4   :  { %182 = vrot.lane.b32.xlu0 %v116_v23, %s1147_s3  ;;  %1084 = vrcp.f32 %v177_v26 }
  0xf1   :  { %v1085_v27 = vpop.eup %1084 }
 0x152   :  { %v188_v28 = vpop.permute.xlu0 %187 }
 0x153   :  { %v190_v29 = vmul.f32 %v1085_v27, %v188_v28 }
 0x155   :  { %192 = vrot.lane.b32.xlu1 %v190_v29, %s1147_s3 }
 0x156   :  { %v183_v30 = vpop.permute.xlu0 %182 }
 0x157   :  { %v185_v31 = vmul.f32 %v1085_v27, %v183_v30 }
 0x1c7   :  { %v193_v32 = vpop.permute.xlu1 %192 }
 0x1c8   :  { %v195_v33 = vadd.f32 %v193_v32, %v185_v31 }
 0x1ca   :  { %1086 = vtanh.f32 %v195_v33  ;;  %v280_v52 = vrot.slane %v195_v33, 6 }
 0x1d7   :  { %v1087_v34 = vpop.eup %1086 }
 0x1d8   :  { %198 = vrot.lane.b32.xlu1 %v1087_v34, %s1146_s5 }
 0x24a   :  { %v199_v35 = vpop.permute.xlu1 %198 }
 0x24b   :  { %v201_v36 = vmul.f32 %v1085_v27, %v199_v35 }
 0x24d   :  { %v1260_v37 = vpack.c.bf16 %v201_v36, %v201_v36 }
 0x24f   :  { %223 = vrot.lane.b32.xlu0 %v1260_v37, %s1147_s3 }
 0x2c1   :  { %v224_v38 = vpop.permute.xlu0 %223 }
 0x2c2   :  { %1018 = vmatmul.mubr.msk.bf16.vlgmr.msra.gmra.mxu0 %vm66_vm2, %v224_v38 }
 0x2c3   :  { %1030 = vmatpush3.bf16.msra.mxu0 %v1203_v2  ;;  %1033 = vmatprep.mubr.msk.bf16.mxu0 %vm1145_vm0, %v1144_v0 }
 0x2c4   :  { %1031 = vmatprep.subr.bf16.mxu0 %v1144_v0 }
 0x2c7   :  { %1032 = vmatpush3.bf16.msra.mxu0 %v1217_v4 }
 0x2c8   :  { %1045 = vmatprep.subr.bf16.mxu0 %v1144_v0 }
 0x382   :  { %v262_v39 = vpop.f32.mrf.mxu0 }
 0x383   :  { %v269_v40 = vrot.slane %v262_v39, 6 }
 0x384   :  { %v1019_v41 = vpop.f32.mrf.mxu0 }
 0x385   :  { %v271_v42 = vadd.f32 %v269_v40, %v1251_v13 }
 0x386   :  { %v265_v43 = vpop.f32.mrf.mxu0 }
 0x387   :  { %1088 = vtanh.f32 %v271_v42  ;;  %v950_v46 = vmul.f32 -1.442695, %v271_v42 }
 0x388   :  { %v1020_v44 = vpop.f32.mrf.mxu0 }
 0x389   :  { %1090 = vpow2.f32 %v950_v46 }
 0x394   :  { %v1089_v45 = vpop.eup %1088 }
 0x395   :  { %284 = vrot.lane.b32.xlu1 %v1089_v45, %s1146_s5 }
 0x396   :  { %v1091_v47 = vpop.eup %1090 }
 0x397   :  { %v275_v48 = vadd.f32 1.0, %v1091_v47 }
 0x399   :  { %1092 = vrcp.f32 %v275_v48 }
 0x3a6   :  { %v1093_v49 = vpop.eup %1092 }
 0x3a7   :  { %v282_v53 = vmul.f32 %v1093_v49, %v280_v52 }
 0x407   :  { %v285_v50 = vpop.permute.xlu1 %284 }
 0x408   :  { %v287_v51 = vmul.f32 %v1093_v49, %v285_v50 }
 0x40a   :  { %289 = vrot.lane.b32.xlu0 %v287_v51, %s1147_s3 }
 0x47c   :  { %v290_v54 = vpop.permute.xlu0 %289 }
 0x47d   :  { %v292_v55 = vadd.f32 %v290_v54, %v282_v53 }
 0x47f   :  { %1094 = vtanh.f32 %v292_v55  ;;  %v379_v16 = vrot.slane %v292_v55, 6 }
 0x48c   :  { %v1095_v56 = vpop.eup %1094 }
 0x48d   :  { %295 = vrot.lane.b32.xlu1 %v1095_v56, %s1146_s5 }
 0x4ff   :  { %v296_v57 = vpop.permute.xlu1 %295 }
 0x500   :  { %v298_v58 = vmul.f32 %v1093_v49, %v296_v57 }
 0x502   :  { %v1275_v59 = vpack.c.bf16 %v298_v58, %v298_v58 }
 0x504   :  { %v321_v60 = vrot.slane %v1275_v59, 1 }
 0x506   :  { %322 = vrot.lane.b32.xlu0 %v321_v60, %s1147_s3 }
 0x578   :  { %v323_v61 = vpop.permute.xlu0 %322 }
 0x579   :  { %1026 = vmatmul.mubr.msk.bf16.vlgmr.msra.gmra.mxu1 %vm66_vm2, %v323_v61 }
 0x57a   :  { %1038 = vmatpush3.bf16.msra.mxu1 %v1203_v2  ;;  %1041 = vmatprep.mubr.msk.bf16.mxu1 %vm1145_vm0, %v1144_v0 }
 0x57b   :  { %1039 = vmatprep.subr.bf16.mxu1 %v1144_v0 }
 0x57e   :  { %1040 = vmatpush3.bf16.msra.mxu1 %v1217_v4 }
 0x57f   :  { %1053 = vmatprep.subr.bf16.mxu1 %v1144_v0 }
 0x639   :  { %v361_v62 = vpop.f32.mrf.mxu1 }
 0x63a   :  { %v368_v63 = vrot.slane %v361_v62, 4 }
 0x63b   :  { %v1027_v1 = vpop.f32.mrf.mxu1 }
 0x63c   :  { %v370_v3 = vadd.f32 %v368_v63, %v1251_v13 }
 0x63d   :  { %v364_v5 = vpop.f32.mrf.mxu1 }
 0x63e   :  { %1096 = vtanh.f32 %v370_v3  ;;  %v953_v8 = vmul.f32 -1.442695, %v370_v3 }
 0x63f   :  { %v1028_v6 = vpop.f32.mrf.mxu1 }
 0x640   :  { %1098 = vpow2.f32 %v953_v8 }
 0x64b   :  { %v1097_v7 = vpop.eup %1096 }
 0x64c   :  { %383 = vrot.lane.b32.xlu1 %v1097_v7, %s1146_s5 }
 0x64d   :  { %v1099_v9 = vpop.eup %1098 }
 0x64e   :  { %v374_v10 = vadd.f32 1.0, %v1099_v9 }
 0x650   :  { %1100 = vrcp.f32 %v374_v10 }
 0x65d   :  { %v1101_v11 = vpop.eup %1100 }
 0x65e   :  { %v381_v17 = vmul.f32 %v1101_v11, %v379_v16 }
 0x6be   :  { %v384_v12 = vpop.permute.xlu1 %383 }
 0x6bf   :  { %v386_v14 = vmul.f32 %v1101_v11, %v384_v12 }
 0x6c1   :  { %388 = vrot.lane.b32.xlu0 %v386_v14, %s1147_s3 }
 0x733   :  { %v389_v18 = vpop.permute.xlu0 %388 }
 0x734   :  { %v391_v19 = vadd.f32 %v389_v18, %v381_v17 }
 0x736   :  { %1102 = vtanh.f32 %v391_v19  ;;  %v478_v40 = vrot.slane %v391_v19, 6 }
 0x743   :  { %v1103_v20 = vpop.eup %1102 }
 0x744   :  { %394 = vrot.lane.b32.xlu1 %v1103_v20, %s1146_s5 }
 0x7b6   :  { %v395_v21 = vpop.permute.xlu1 %394 }
 0x7b7   :  { %v397_v22 = vmul.f32 %v1101_v11, %v395_v21 }
 0x7b9   :  { %v1290_v23 = vpack.c.bf16 %v397_v22, %v397_v22 }
 0x7bb   :  { %v420_v24 = vrot.slane %v1290_v23, 2 }
 0x7bd   :  { %421 = vrot.lane.b32.xlu0 %v420_v24, %s1147_s3 }
 0x82f   :  { %v422_v25 = vpop.permute.xlu0 %421 }
 0x830   :  { %1034 = vmatmul.mubr.msk.bf16.vlgmr.msra.gmra.mxu0 %vm66_vm2, %v422_v25 }
 0x831   :  { %1046 = vmatpush3.bf16.msra.mxu0 %v1203_v2  ;;  %1049 = vmatprep.mubr.msk.bf16.mxu0 %vm1145_vm0, %v1144_v0 }
 0x832   :  { %1047 = vmatprep.subr.bf16.mxu0 %v1144_v0 }
 0x835   :  { %1048 = vmatpush3.bf16.msra.mxu0 %v1217_v4 }
 0x836   :  { %1061 = vmatprep.subr.bf16.mxu0 %v1144_v0 }
 0x8f0   :  { %v460_v26 = vpop.f32.mrf.mxu0 }
 0x8f1   :  { %v467_v27 = vrot.slane %v460_v26, 2 }
 0x8f2   :  { %v1035_v28 = vpop.f32.mrf.mxu0 }
 0x8f3   :  { %v469_v29 = vadd.f32 %v467_v27, %v1251_v13 }
 0x8f4   :  { %v463_v30 = vpop.f32.mrf.mxu0 }
 0x8f5   :  { %1104 = vtanh.f32 %v469_v29  ;;  %v956_v33 = vmul.f32 -1.442695, %v469_v29 }
 0x8f6   :  { %v1036_v31 = vpop.f32.mrf.mxu0 }
 0x8f7   :  { %1106 = vpow2.f32 %v956_v33 }
 0x902   :  { %v1105_v32 = vpop.eup %1104 }
 0x903   :  { %482 = vrot.lane.b32.xlu1 %v1105_v32, %s1146_s5 }
 0x904   :  { %v1107_v34 = vpop.eup %1106 }
 0x905   :  { %v473_v35 = vadd.f32 1.0, %v1107_v34 }
 0x907   :  { %1108 = vrcp.f32 %v473_v35 }
 0x914   :  { %v1109_v36 = vpop.eup %1108 }
 0x915   :  { %v480_v41 = vmul.f32 %v1109_v36, %v478_v40 }
 0x975   :  { %v483_v38 = vpop.permute.xlu1 %482 }
 0x976   :  { %v485_v39 = vmul.f32 %v1109_v36, %v483_v38 }
 0x978   :  { %487 = vrot.lane.b32.xlu0 %v485_v39, %s1147_s3 }
 0x9ea   :  { %v488_v42 = vpop.permute.xlu0 %487 }
 0x9eb   :  { %v490_v13 = vadd.f32 %v488_v42, %v480_v41 }
 0x9ed   :  { %1110 = vtanh.f32 %v490_v13  ;;  %v575_v62 = vrot.slane %v490_v13, 6 }
 0x9fa   :  { %v1111_v43 = vpop.eup %1110 }
 0x9fb   :  { %493 = vrot.lane.b32.xlu1 %v1111_v43, %s1146_s5 }
 0xa6d   :  { %v494_v44 = vpop.permute.xlu1 %493 }
 0xa6e   :  { %v496_v45 = vmul.f32 %v1109_v36, %v494_v44 }
 0xa70   :  { %v1305_v46 = vpack.c.bf16 %v496_v45, %v496_v45 }
 0xa72   :  { %v520_v47 = vrot.slane %v1305_v46, 3 }
 0xa74   :  { %521 = vrot.lane.b32.xlu0 %v520_v47, %s1147_s3 }
 0xae6   :  { %v522_v48 = vpop.permute.xlu0 %521 }
 0xae7   :  { %1042 = vmatmul.mubr.msk.bf16.vlgmr.msra.gmra.mxu1 %vm66_vm2, %v522_v48 }
 0xae8   :  { %1054 = vmatpush3.bf16.msra.mxu1 %v1203_v2  ;;  %1057 = vmatprep.mubr.msk.bf16.mxu1 %vm1145_vm0, %v1144_v0 }
 0xae9   :  { %1055 = vmatprep.subr.bf16.mxu1 %v1144_v0 }
 0xaec   :  { %1056 = vmatpush3.bf16.msra.mxu1 %v1217_v4 }
 0xba7   :  { %v560_v49 = vpop.f32.mrf.mxu1 }
 0xba8   :  { %v566_v50 = vadd.f32 %v560_v49, %v1253_v15 }
 0xba9   :  { %v1043_v51 = vpop.f32.mrf.mxu1 }
 0xbaa   :  { %1112 = vtanh.f32 %v566_v50  ;;  %v959_v55 = vmul.f32 -1.442695, %v566_v50 }
 0xbab   :  { %v563_v52 = vpop.f32.mrf.mxu1 }
 0xbac   :  { %1114 = vpow2.f32 %v959_v55 }
 0xbad   :  { %v1044_v53 = vpop.f32.mrf.mxu1 }
 0xbb7   :  { %v1113_v54 = vpop.eup %1112 }
 0xbb8   :  { %579 = vrot.lane.b32.xlu1 %v1113_v54, %s1146_s5 }
 0xbb9   :  { %v1115_v56 = vpop.eup %1114 }
 0xbba   :  { %v570_v57 = vadd.f32 1.0, %v1115_v56 }
 0xbbc   :  { %1116 = vrcp.f32 %v570_v57 }
 0xbc9   :  { %v1117_v58 = vpop.eup %1116 }
 0xbca   :  { %v577_v63 = vmul.f32 %v1117_v58, %v575_v62 }
 0xc2a   :  { %v580_v60 = vpop.permute.xlu1 %579 }
 0xc2b   :  { %v582_v61 = vmul.f32 %v1117_v58, %v580_v60 }
 0xc2d   :  { %584 = vrot.lane.b32.xlu0 %v582_v61, %s1147_s3 }
 0xc9f   :  { %v585_v1 = vpop.permute.xlu0 %584 }
 0xca0   :  { %v587_v3 = vadd.f32 %v585_v1, %v577_v63 }
 0xca2   :  { %1118 = vtanh.f32 %v587_v3 }
 0xcaf   :  { %v1119_v5 = vpop.eup %1118 }
 0xcb0   :  { %590 = vrot.lane.b32.xlu1 %v1119_v5, %s1146_s5 }
 0xd22   :  { %v591_v6 = vpop.permute.xlu1 %590 }
 0xd23   :  { %v593_v7 = vmul.f32 %v1117_v58, %v591_v6 }
 0xd25   :  { %v1319_v8 = vpack.c.bf16 %v593_v7, %v593_v7  ;;  %v1148_v7 = vmov 1966171168  }
 0xd27   :  { %615 = vrot.lane.b32.xlu0 %v1319_v8, %s1147_s3 }
 0xd99   :  { %v616_v9 = vpop.permute.xlu0 %615 }
 0xd9a   :  { %1050 = vmatmul.mubr.msk.bf16.vlgmr.msra.gmra.mxu0 %vm66_vm2, %v616_v9  ;;  %v205_v9 = vunpack.c.l.s4 %v1148_v7 }
 0xd9b   :  { %1062 = vmatpush3.bf16.msra.mxu0 %v1203_v2  ;;  %1065 = vmatprep.mubr.msk.bf16.mxu0 %vm1145_vm0, %v1144_v0 }
 0xd9c   :  { %1063 = vmatprep.subr.bf16.mxu0 %v1144_v0 }
 0xd9f   :  { %1064 = vmatpush3.bf16.msra.mxu0 %v1217_v4  ;;  %v672_v4 = vrot.slane %v587_v3, 6 }
 0xe5a   :  { %v654_v10 = vpop.f32.mrf.mxu0 }
 0xe5b   :  { %v661_v11 = vrot.slane %v654_v10, 6  ;;  %v207_v10 = vlaneseq }
 0xe5c   :  { %v1051_v12 = vpop.f32.mrf.mxu0 }
 0xe5d   :  { %v663_v14 = vadd.f32 %v661_v11, %v1253_v15  ;;  %v206_v11 = vunpack.c.0.s8 %v205_v9  ;;  %v208_v12 = vshrl.u32 %v207_v10, 7 }
 0xe5e   :  { %v657_v16 = vpop.f32.mrf.mxu0 }
 0xe5f   :  { %1120 = vtanh.f32 %v663_v14  ;;  %v962_v19 = vmul.f32 -1.442695, %v663_v14  ;;  %v209_v14 = vsub.s32 %v206_v11, %v208_v12 }
 0xe60   :  { %v1052_v17 = vpop.f32.mrf.mxu0 }
 0xe61   :  { %1122 = vpow2.f32 %v962_v19 }
 0xe6c   :  { %v1121_v18 = vpop.eup %1120 }
 0xe6d   :  { %676 = vrot.lane.b32.xlu1 %v1121_v18, %s1146_s5  ;;  %v406_v18 = vrot.slane %v1290_v23, %v209_v14 }
 0xe6e   :  { %v1123_v2 = vpop.eup %1122 }
 0xe6f   :  { %v667_v20 = vadd.f32 1.0, %v1123_v2 }
 0xe71   :  { %1124 = vrcp.f32 %v667_v20  ;;  %v413_v20 = vrot.slane %v406_v18, %v209_v14 }
 0xe7e   :  { %v1125_v21 = vpop.eup %1124 }
 0xe7f   :  { %v674_v24 = vmul.f32 %v1125_v21, %v672_v4 }
 0xedf   :  { %v677_v0 = vpop.permute.xlu1 %676 }
 0xee0   :  { %v679_v22 = vmul.f32 %v1125_v21, %v677_v0 }
 0xee2   :  { %681 = vrot.lane.b32.xlu0 %v679_v22, %s1147_s3  ;;  %v414_v22 = vcombine.high %v413_v20, %v413_v20 }
 0xf54   :  { %v682_v25 = vpop.permute.xlu0 %681 }
 0xf55   :  { %v684_v26 = vadd.f32 %v682_v25, %v674_v24 }
 0xf57   :  { %1126 = vtanh.f32 %v684_v26  ;;  %v771_v47 = vrot.slane %v684_v26, 6 }
 0xf64   :  { %v1127_v27 = vpop.eup %1126 }
 0xf65   :  { %687 = vrot.lane.b32.xlu1 %v1127_v27, %s1146_s5 }
 0xfd7   :  { %v688_v28 = vpop.permute.xlu1 %687 }
 0xfd8   :  { %v690_v29 = vmul.f32 %v1125_v21, %v688_v28  ;;  %v602_v21 = vrot.slane %v1319_v8, %v209_v14 }
 0xfda   :  { %v1333_v30 = vpack.c.bf16 %v690_v29, %v690_v29  ;;  %v609_v4 = vrot.slane %v602_v21, %v209_v14  ;;  %v307_v29 = vrot.slane %v1275_v59, %v209_v14 }
 0xfdc   :  { %v713_v31 = vrot.slane %v1333_v30, 1  ;;  %v699_v59 = vrot.slane %v1333_v30, %v209_v14 }
 0xfde   :  { %714 = vrot.lane.b32.xlu0 %v713_v31, %s1147_s3  ;;  %v505_v31 = vrot.slane %v1305_v46, %v209_v14 }
0x1050   :  { %v715_v32 = vpop.permute.xlu0 %714 }
0x1051   :  { %1058 = vmatmul.mubr.msk.bf16.vlgmr.msra.gmra.mxu1 %vm66_vm2, %v715_v32 }
0x1111   :  { %v753_v33 = vpop.f32.mrf.mxu1 }
0x1112   :  { %v760_v34 = vrot.slane %v753_v33, 4  ;;  %v308_v33 = vcombine.high %v307_v29, %v307_v29 }
0x1113   :  { %v1059_v35 = vpop.f32.mrf.mxu1 }
0x1114   :  { %v762_v36 = vadd.f32 %v760_v34, %v1253_v15  ;;  %v506_v34 = vcombine.high %v505_v31, %v505_v31  ;;  %v315_v46 = vrot.slane %v308_v33, %v209_v14 }
0x1115   :  { %v756_v38 = vpop.f32.mrf.mxu1 }
0x1116   :  { %1128 = vtanh.f32 %v762_v36  ;;  %v965_v41 = vmul.f32 -1.442695, %v762_v36  ;;  %v513_v38 = vrot.slane %v506_v34, %v209_v14 }
0x1117   :  { %v1060_v39 = vpop.f32.mrf.mxu1 }
0x1118   :  { %1130 = vpow2.f32 %v965_v41  ;;  %v700_v39 = vcombine.high %v699_v59, %v699_v59 }
0x111a   :  { %v707_v41 = vrot.slane %v700_v39, %v209_v14 }
0x1123   :  { %v1129_v40 = vpop.eup %1128 }
0x1124   :  { %775 = vrot.lane.b32.xlu1 %v1129_v40, %s1146_s5  ;;  %v514_v40 = vcombine.high %v513_v38, %v513_v38 }
0x1125   :  { %v1131_v42 = vpop.eup %1130 }
0x1126   :  { %v766_v13 = vadd.f32 1.0, %v1131_v42 }
0x1128   :  { %1132 = vrcp.f32 %v766_v13 }
0x1135   :  { %v1133_v43 = vpop.eup %1132 }
0x1136   :  { %v773_v48 = vmul.f32 %v1133_v43, %v771_v47 }
0x1196   :  { %v776_v44 = vpop.permute.xlu1 %775 }
0x1197   :  { %v778_v45 = vmul.f32 %v1133_v43, %v776_v44 }
0x1199   :  { %780 = vrot.lane.b32.xlu0 %v778_v45, %s1147_s3 }
0x120b   :  { %v781_v49 = vpop.permute.xlu0 %780 }
0x120c   :  { %v783_v50 = vadd.f32 %v781_v49, %v773_v48 }
0x120e   :  { %1134 = vtanh.f32 %v783_v50  ;;  %v870_v23 = vrot.slane %v783_v50, 6 }
0x121b   :  { %v1135_v51 = vpop.eup %1134 }
0x121c   :  { %786 = vrot.lane.b32.xlu1 %v1135_v51, %s1146_s5 }
0x128e   :  { %v787_v52 = vpop.permute.xlu1 %786 }
0x128f   :  { %v789_v53 = vmul.f32 %v1133_v43, %v787_v52 }
0x1291   :  { %v790_v54 = vpack.c.bf16 %v789_v53, %v789_v53 }
0x1293   :  { %v812_v55 = vrot.slane %v790_v54, 2  ;;  %v798_v0 = vrot.slane %v790_v54, %v209_v14 }
0x1295   :  { %813 = vrot.lane.b32.xlu0 %v812_v55, %s1147_s3  ;;  %v805_v24 = vrot.slane %v798_v0, %v209_v14 }
0x1307   :  { %v814_v56 = vpop.permute.xlu0 %813 }
0x1308   :  { %1066 = vmatmul.mubr.msk.bf16.vlgmr.msra.gmra.mxu0 %vm66_vm2, %v814_v56 }
0x13c8   :  { %v852_v57 = vpop.f32.mrf.mxu0 }
0x13c9   :  { %v859_v58 = vrot.slane %v852_v57, 2 }
0x13ca   :  { %v1067_v60 = vpop.f32.mrf.mxu0 }
0x13cb   :  { %v861_v61 = vadd.f32 %v859_v58, %v1253_v15  ;;  %v210_v15 = vrot.slane %v1260_v37, %v209_v14  ;;  %v806_v37 = vcombine.high %v805_v24, %v805_v24 }
0x13cc   :  { %v855_v62 = vpop.f32.mrf.mxu0 }
0x13cd   :  { %1136 = vtanh.f32 %v861_v61  ;;  %v968_v3 = vmul.f32 -1.442695, %v861_v61  ;;  %v217_v2 = vrot.slane %v210_v15, %v209_v14 }
0x13ce   :  { %v1068_v63 = vpop.f32.mrf.mxu0 }
0x13cf   :  { %1138 = vpow2.f32 %v968_v3 }
0x13da   :  { %v1137_v1 = vpop.eup %1136 }
0x13db   :  { %874 = vrot.lane.b32.xlu1 %v1137_v1, %s1146_s5 }
0x13dc   :  { %v1139_v5 = vpop.eup %1138 }
0x13dd   :  { %v865_v6 = vadd.f32 1.0, %v1139_v5 }
0x13df   :  { %1140 = vrcp.f32 %v865_v6 }
0x13ec   :  { %v1141_v16 = vpop.eup %1140 }
0x13ed   :  { %v872_v25 = vmul.f32 %v1141_v16, %v870_v23 }
0x144d   :  { %v875_v17 = vpop.permute.xlu1 %874 }
0x144e   :  { %v877_v19 = vmul.f32 %v1141_v16, %v875_v17 }
0x1450   :  { %879 = vrot.lane.b32.xlu0 %v877_v19, %s1147_s3 }
0x1454   :  { %218 = vrot.lane.b32.xlu0 %v217_v2, %s1147_s3 }
0x1458   :  { %415 = vrot.lane.b32.xlu0 %v414_v22, %s1147_s3 }
0x145c   :  { %610 = vrot.lane.b32.xlu0 %v609_v4, %s1147_s3 }
0x1460   :  { %807 = vrot.lane.b32.xlu0 %v806_v37, %s1147_s3 }
0x14c2   :  { %v880_v26 = vpop.permute.xlu0 %879 }
0x14c3   :  { %v882_v27 = vadd.f32 %v880_v26, %v872_v25 }
0x14c5   :  { %1142 = vtanh.f32 %v882_v27 }
0x14c6   :  { %v219_v28 = vpop.permute.xlu0 %218 }
0x14c7   :  { %222 = vst.msk [vmem:[%s1407_s6] sm:$0x1] %vm221_vm3, %v219_v28 }
0x14ca   :  { %v416_v8 = vpop.permute.xlu0 %415 }
0x14cb   :  { %954 = vst.msk [vmem:[%s1407_s6 + $0x2] sm:$0x1] %vm221_vm3, %v416_v8 }
0x14ce   :  { %v611_v32 = vpop.permute.xlu0 %610 }
0x14cf   :  { %960 = vst.msk [vmem:[%s1407_s6 + $0x4] sm:$0x1] %vm221_vm3, %v611_v32 }
0x14d2   :  { %v1143_v35 = vpop.eup %1142  ;;  %v808_v36 = vpop.permute.xlu0 %807 }
0x14d3   :  { %966 = vst.msk [vmem:[%s1407_s6 + $0x6] sm:$0x1] %vm221_vm3, %v808_v36  ;;  %885 = vrot.lane.b32.xlu1 %v1143_v35, %s1146_s5 }
0x14d7   :  { %316 = vrot.lane.b32.xlu1 %v315_v46, %s1147_s3 }
0x14db   :  { %515 = vrot.lane.b32.xlu1 %v514_v40, %s1147_s3 }
0x14df   :  { %708 = vrot.lane.b32.xlu1 %v707_v41, %s1147_s3 }
0x1545   :  { %v886_v42 = vpop.permute.xlu1 %885 }
0x1546   :  { %v888_v13 = vmul.f32 %v1141_v16, %v886_v42 }
0x1548   :  { %v889_v43 = vpack.c.bf16 %v888_v13, %v888_v13  ;;  %913 = vrot.lane.b32.xlu0 %v888_v13, %s1147_s3 }
0x1549   :  { %v317_v44 = vpop.permute.xlu1 %316 }
0x154a   :  { %v897_v45 = vrot.slane %v889_v43, %v209_v14  ;;  %951 = vst.msk [vmem:[%s1407_s6 + $0x1] sm:$0x1] %vm221_vm3, %v317_v44 }
0x154c   :  { %v898_v30 = vcombine.high %v897_v45, %v897_v45 }
0x154d   :  { %v516_v47 = vpop.permute.xlu1 %515 }
0x154e   :  { %957 = vst.msk [vmem:[%s1407_s6 + $0x3] sm:$0x1] %vm221_vm3, %v516_v47  ;;  %v905_v48 = vrot.slane %v898_v30, %v209_v14 }
0x1550   :  { %v906_v49 = vcombine.high %v905_v48, %v905_v48 }
0x1551   :  { %v709_v50 = vpop.permute.xlu1 %708 }
0x1552   :  { %963 = vst.msk [vmem:[%s1407_s6 + $0x5] sm:$0x1] %vm221_vm3, %v709_v50  ;;  %907 = vrot.lane.b32.xlu1 %v906_v49, %s1147_s3 }
0x1556   :  { %919 = vrot.lane.b32.xlu1 %v882_v27, %s1149_s9 }
0x15ba   :  { %v914_v51 = vpop.permute.xlu0 %913 }
0x15bb   :  { %917 = vst.msk [vmem:[#allocation2 - $0x6] sm:$0xc0] %vm916_vm4, %v914_v51  ;;  %926 = vst.msk [vmem:[%s1408_s7 - $0x6] sm:$0xc0] %vm916_vm4, %v914_v51 }
0x15c4   :  { %v908_v52 = vpop.permute.xlu1 %907 }
0x15c5   :  { %969 = vst.msk [vmem:[%s1407_s6 + $0x7] sm:$0x1] %vm221_vm3, %v908_v52 }
0x15c8   :  { %v920_v53 = vpop.permute.xlu1 %919 }
0x15c9   :  { %922 = vst.msk [vmem:[#allocation3 - $0x6] sm:$0xc0] %vm916_vm4, %v920_v53  ;;  %927 = vst.msk [vmem:[%s1409_s8 - $0x6] sm:$0xc0] %vm916_vm4, %v920_v53 }

// kernel: mol_lstm_forward.3
= control target key start
LH: loop header
LB: loop body
LE: loop exit
PB: predicated region body
PF: predicated region fallthrough
CT: control target
= control target key end

     0   :  { %v1132_v0 = vmov 0.0   ;;  %vm1133_vm0 = vmmov 0   ;;  %vm58_vm1 = vcmask 130048   ;;  %vm32_vm2 = vcmask 254976   ;;  %s1137_s29 = smov 96   ;;  %s1384_s1 = inlined_call_operand.vmem [shape: bf16[16,128], index: 1, kind: input, shape index: {}]   ;;  %s1385_s2 = inlined_call_operand.vmem [shape: bf16[32,128], index: 2, kind: input, shape index: {}]   ;;  %s1386_s0 = inlined_call_operand.vmem [shape: bf16[16,16], index: 0, kind: input, shape index: {}]   ;;  %s1387_s4 = inlined_call_operand.vmem [shape: f32[2,32], index: 4, kind: input, shape index: {}, may-alias: {4,5}]   ;;  %s1388_s5 = inlined_call_operand.vmem [shape: f32[2,32], index: 5, kind: input, shape index: {}, may-alias: {4,5}]   ;;  %s1389_s3 = inlined_call_operand.vmem [shape: f32[1,128], index: 3, kind: input, shape index: {}]   ;;  %s1390_s6 = inlined_call_operand.vmem [shape: bf16[8,2,32], index: 6, kind: output, shape index: {0}]   ;;  %s1391_s7 = inlined_call_operand.vmem [shape: f32[2,32], index: 7, kind: output, shape index: {1}]   ;;  %s1392_s8 = inlined_call_operand.vmem [shape: f32[2,32], index: 8, kind: output, shape index: {2}]  }
   0x1   :  { %988 = vmatprep.subr.bf16.mxu0 %v1132_v0  ;;  %v1064_v1 = vld [vmem:[%s1384_s1] sm:$0xff]   ;;  %994 = vmatprep.subr.bf16.mxu1 %v1132_v0  ;;  %v1191_v2 = vld [vmem:[%s1385_s2 + $0x8] sm:$0xff]   ;;  %vm122_vm3 = vcmask 261120   ;;  %vm214_vm4 = vcmask 253952   ;;  %vm909_vm5 = vcmask 261126  }
   0x2   :  { %990 = vmatprep.mubr.msk.bf16.mxu0 %vm1133_vm0, %v1132_v0  ;;  %998 = vmatprep.mubr.msk.bf16.mxu1 %vm1133_vm0, %v1132_v0  ;;  %v1066_v3 = vld [vmem:[%s1386_s0] sm:$0xff]  }
   0x3   :  { %989 = vmatpush3.bf16.msra.mxu0 %v1064_v1  ;;  %995 = vmatpush3.bf16.msra.mxu1 %v1191_v2  ;;  %v1204_v4 = vld [vmem:[%s1385_s2] sm:$0xff]  }
   0x4   :  { %1002 = vmatprep.subr.bf16.mxu0 %v1132_v0  ;;  %996 = vmatprep.subr.bf16.mxu1 %v1132_v0  ;;  %v31_v5 = vld [vmem:[%s1387_s4] sm:$0x3] }
   0x5   :  { %33 = vst.msk [vmem:[#allocation2] sm:$0x3] %vm32_vm2, %v31_v5  ;;  %v34_v8 = vld [vmem:[%s1388_s5] sm:$0x3]  ;;  %s1134_s5 = smov 64  }
   0x6   :  { %991 = vmatmul.mubr.msk.bf16.vlgmr.msra.gmra.mxu0 %vm58_vm1, %v1066_v3  ;;  %35 = vst.msk [vmem:[#allocation3] sm:$0x3] %vm32_vm2, %v34_v8  ;;  %v933_v10 = vld [vmem:[%s1389_s3] ss:$0 sm:$0xff]  ;;  %s1135_s3 = smov 32  }
   0x7   :  { %1003 = vmatpush3.bf16.msra.mxu0 %v1191_v2  ;;  %1006 = vmatprep.mubr.msk.bf16.mxu0 %vm1133_vm0, %v1132_v0 }
   0x8   :  { %997 = vmatpush3.bf16.msra.mxu1 %v1204_v4  ;;  %1004 = vmatprep.subr.bf16.mxu0 %v1132_v0 }
   0x9   :  { %1010 = vmatprep.subr.bf16.mxu1 %v1132_v0 }
   0xb   :  { %1005 = vmatpush3.bf16.msra.mxu0 %v1204_v4 }
   0xc   :  { %1018 = vmatprep.subr.bf16.mxu0 %v1132_v0  ;;  %v107_v6 = vld [vmem:[#allocation2] sm:$0x3] }
   0xd   :  { %v109_v7 = vpack.c.bf16 %v107_v6, %v107_v6  ;;  %v108_v22 = vld [vmem:[#allocation3] sm:$0x3] }
   0xf   :  { %999 = vmatmul.mubr.msk.bf16.vlgmr.msra.gmra.mxu1 %vm122_vm3, %v109_v7 }
  0x10   :  { %1011 = vmatpush3.bf16.msra.mxu1 %v1191_v2  ;;  %1014 = vmatprep.mubr.msk.bf16.mxu1 %vm1133_vm0, %v1132_v0 }
  0x11   :  { %1012 = vmatprep.subr.bf16.mxu1 %v1132_v0 }
  0x14   :  { %1013 = vmatpush3.bf16.msra.mxu1 %v1204_v4 }
  0x15   :  { %1026 = vmatprep.subr.bf16.mxu1 %v1132_v0 }
  0xc6   :  { %v96_v9 = vpop.f32.mrf.mxu0 }
  0xc7   :  { %v1236_v15 = vadd.f32 %v933_v10, %v96_v9 }
  0xc8   :  { %v992_v11 = vpop.f32.mrf.mxu0 }
  0xca   :  { %v99_v12 = vpop.f32.mrf.mxu0 }
  0xcb   :  { %v1234_v13 = vadd.f32 %v933_v10, %v99_v12 }
  0xcc   :  { %v993_v14 = vpop.f32.mrf.mxu0 }
  0xcf   :  { %v160_v16 = vpop.f32.mrf.mxu1 }
  0xd0   :  { %v166_v17 = vadd.f32 %v160_v16, %v1236_v15 }
  0xd1   :  { %v1000_v18 = vpop.f32.mrf.mxu1 }
  0xd2   :  { %1068 = vtanh.f32 %v166_v17  ;;  %v940_v23 = vmul.f32 -1.442695, %v166_v17 }
  0xd3   :  { %v163_v19 = vpop.f32.mrf.mxu1 }
  0xd4   :  { %1070 = vpow2.f32 %v940_v23 }
  0xd5   :  { %v1001_v20 = vpop.f32.mrf.mxu1 }
  0xdf   :  { %v1069_v21 = vpop.eup %1068 }
  0xe0   :  { %180 = vrot.lane.b32.xlu0 %v1069_v21, %s1134_s5 }
  0xe1   :  { %v1071_v24 = vpop.eup %1070 }
  0xe2   :  { %v170_v25 = vadd.f32 1.0, %v1071_v24 }
  0xe4   :  { %175 = vrot.lane.b32.xlu0 %v108_v22, %s1135_s3  ;;  %1072 = vrcp.f32 %v170_v25 }
  0xf1   :  { %v1073_v26 = vpop.eup %1072 }
 0x152   :  { %v181_v27 = vpop.permute.xlu0 %180 }
 0x153   :  { %v183_v28 = vmul.f32 %v1073_v26, %v181_v27 }
 0x155   :  { %185 = vrot.lane.b32.xlu1 %v183_v28, %s1135_s3 }
 0x156   :  { %v176_v29 = vpop.permute.xlu0 %175 }
 0x157   :  { %v178_v30 = vmul.f32 %v1073_v26, %v176_v29 }
 0x1c7   :  { %v186_v31 = vpop.permute.xlu1 %185 }
 0x1c8   :  { %v188_v32 = vadd.f32 %v186_v31, %v178_v30 }
 0x1ca   :  { %1074 = vtanh.f32 %v188_v32  ;;  %v273_v51 = vrot.slane %v188_v32, 6 }
 0x1d7   :  { %v1075_v33 = vpop.eup %1074 }
 0x1d8   :  { %191 = vrot.lane.b32.xlu1 %v1075_v33, %s1134_s5 }
 0x24a   :  { %v192_v34 = vpop.permute.xlu1 %191 }
 0x24b   :  { %v194_v35 = vmul.f32 %v1073_v26, %v192_v34 }
 0x24d   :  { %v1243_v36 = vpack.c.bf16 %v194_v35, %v194_v35 }
 0x24f   :  { %216 = vrot.lane.b32.xlu0 %v1243_v36, %s1135_s3 }
 0x2c1   :  { %v217_v37 = vpop.permute.xlu0 %216 }
 0x2c2   :  { %1007 = vmatmul.mubr.msk.bf16.vlgmr.msra.gmra.mxu0 %vm122_vm3, %v217_v37 }
 0x2c3   :  { %1019 = vmatpush3.bf16.msra.mxu0 %v1191_v2  ;;  %1022 = vmatprep.mubr.msk.bf16.mxu0 %vm1133_vm0, %v1132_v0 }
 0x2c4   :  { %1020 = vmatprep.subr.bf16.mxu0 %v1132_v0 }
 0x2c7   :  { %1021 = vmatpush3.bf16.msra.mxu0 %v1204_v4 }
 0x2c8   :  { %1034 = vmatprep.subr.bf16.mxu0 %v1132_v0 }
 0x382   :  { %v255_v38 = vpop.f32.mrf.mxu0 }
 0x383   :  { %v262_v39 = vrot.slane %v255_v38, 6 }
 0x384   :  { %v1008_v40 = vpop.f32.mrf.mxu0 }
 0x385   :  { %v264_v41 = vadd.f32 %v262_v39, %v1236_v15 }
 0x386   :  { %v258_v42 = vpop.f32.mrf.mxu0 }
 0x387   :  { %1076 = vtanh.f32 %v264_v41  ;;  %v942_v45 = vmul.f32 -1.442695, %v264_v41 }
 0x388   :  { %v1009_v43 = vpop.f32.mrf.mxu0 }
 0x389   :  { %1078 = vpow2.f32 %v942_v45 }
 0x394   :  { %v1077_v44 = vpop.eup %1076 }
 0x395   :  { %277 = vrot.lane.b32.xlu1 %v1077_v44, %s1134_s5 }
 0x396   :  { %v1079_v46 = vpop.eup %1078 }
 0x397   :  { %v268_v47 = vadd.f32 1.0, %v1079_v46 }
 0x399   :  { %1080 = vrcp.f32 %v268_v47 }
 0x3a6   :  { %v1081_v48 = vpop.eup %1080 }
 0x3a7   :  { %v275_v52 = vmul.f32 %v1081_v48, %v273_v51 }
 0x407   :  { %v278_v49 = vpop.permute.xlu1 %277 }
 0x408   :  { %v280_v50 = vmul.f32 %v1081_v48, %v278_v49 }
 0x40a   :  { %282 = vrot.lane.b32.xlu0 %v280_v50, %s1135_s3 }
 0x47c   :  { %v283_v53 = vpop.permute.xlu0 %282 }
 0x47d   :  { %v285_v54 = vadd.f32 %v283_v53, %v275_v52 }
 0x47f   :  { %1082 = vtanh.f32 %v285_v54  ;;  %v372_v14 = vrot.slane %v285_v54, 6 }
 0x48c   :  { %v1083_v55 = vpop.eup %1082 }
 0x48d   :  { %288 = vrot.lane.b32.xlu1 %v1083_v55, %s1134_s5 }
 0x4ff   :  { %v289_v56 = vpop.permute.xlu1 %288 }
 0x500   :  { %v291_v57 = vmul.f32 %v1081_v48, %v289_v56 }
 0x502   :  { %v1258_v58 = vpack.c.bf16 %v291_v57, %v291_v57 }
 0x504   :  { %v314_v59 = vrot.slane %v1258_v58, 1 }
 0x506   :  { %315 = vrot.lane.b32.xlu0 %v314_v59, %s1135_s3 }
 0x578   :  { %v316_v60 = vpop.permute.xlu0 %315 }
 0x579   :  { %1015 = vmatmul.mubr.msk.bf16.vlgmr.msra.gmra.mxu1 %vm122_vm3, %v316_v60 }
 0x57a   :  { %1027 = vmatpush3.bf16.msra.mxu1 %v1191_v2  ;;  %1030 = vmatprep.mubr.msk.bf16.mxu1 %vm1133_vm0, %v1132_v0 }
 0x57b   :  { %1028 = vmatprep.subr.bf16.mxu1 %v1132_v0 }
 0x57e   :  { %1029 = vmatpush3.bf16.msra.mxu1 %v1204_v4 }
 0x57f   :  { %1042 = vmatprep.subr.bf16.mxu1 %v1132_v0 }
 0x639   :  { %v354_v61 = vpop.f32.mrf.mxu1 }
 0x63a   :  { %v361_v62 = vrot.slane %v354_v61, 4 }
 0x63b   :  { %v1016_v63 = vpop.f32.mrf.mxu1 }
 0x63c   :  { %v363_v1 = vadd.f32 %v361_v62, %v1236_v15 }
 0x63d   :  { %v357_v3 = vpop.f32.mrf.mxu1 }
 0x63e   :  { %1084 = vtanh.f32 %v363_v1  ;;  %v945_v7 = vmul.f32 -1.442695, %v363_v1 }
 0x63f   :  { %v1017_v5 = vpop.f32.mrf.mxu1 }
 0x640   :  { %1086 = vpow2.f32 %v945_v7 }
 0x64b   :  { %v1085_v6 = vpop.eup %1084 }
 0x64c   :  { %376 = vrot.lane.b32.xlu1 %v1085_v6, %s1134_s5 }
 0x64d   :  { %v1087_v8 = vpop.eup %1086 }
 0x64e   :  { %v367_v9 = vadd.f32 1.0, %v1087_v8 }
 0x650   :  { %1088 = vrcp.f32 %v367_v9 }
 0x65d   :  { %v1089_v10 = vpop.eup %1088 }
 0x65e   :  { %v374_v16 = vmul.f32 %v1089_v10, %v372_v14 }
 0x6be   :  { %v377_v11 = vpop.permute.xlu1 %376 }
 0x6bf   :  { %v379_v12 = vmul.f32 %v1089_v10, %v377_v11 }
 0x6c1   :  { %381 = vrot.lane.b32.xlu0 %v379_v12, %s1135_s3 }
 0x733   :  { %v382_v17 = vpop.permute.xlu0 %381 }
 0x734   :  { %v384_v18 = vadd.f32 %v382_v17, %v374_v16 }
 0x736   :  { %1090 = vtanh.f32 %v384_v18  ;;  %v471_v39 = vrot.slane %v384_v18, 6 }
 0x743   :  { %v1091_v19 = vpop.eup %1090 }
 0x744   :  { %387 = vrot.lane.b32.xlu1 %v1091_v19, %s1134_s5 }
 0x7b6   :  { %v388_v20 = vpop.permute.xlu1 %387 }
 0x7b7   :  { %v390_v21 = vmul.f32 %v1089_v10, %v388_v20 }
 0x7b9   :  { %v1273_v22 = vpack.c.bf16 %v390_v21, %v390_v21 }
 0x7bb   :  { %v413_v23 = vrot.slane %v1273_v22, 2 }
 0x7bd   :  { %414 = vrot.lane.b32.xlu0 %v413_v23, %s1135_s3 }
 0x82f   :  { %v415_v24 = vpop.permute.xlu0 %414 }
 0x830   :  { %1023 = vmatmul.mubr.msk.bf16.vlgmr.msra.gmra.mxu0 %vm122_vm3, %v415_v24 }
 0x831   :  { %1035 = vmatpush3.bf16.msra.mxu0 %v1191_v2  ;;  %1038 = vmatprep.mubr.msk.bf16.mxu0 %vm1133_vm0, %v1132_v0 }
 0x832   :  { %1036 = vmatprep.subr.bf16.mxu0 %v1132_v0 }
 0x835   :  { %1037 = vmatpush3.bf16.msra.mxu0 %v1204_v4 }
 0x836   :  { %1050 = vmatprep.subr.bf16.mxu0 %v1132_v0 }
 0x8f0   :  { %v453_v25 = vpop.f32.mrf.mxu0 }
 0x8f1   :  { %v460_v26 = vrot.slane %v453_v25, 2 }
 0x8f2   :  { %v1024_v27 = vpop.f32.mrf.mxu0 }
 0x8f3   :  { %v462_v28 = vadd.f32 %v460_v26, %v1236_v15 }
 0x8f4   :  { %v456_v29 = vpop.f32.mrf.mxu0 }
 0x8f5   :  { %1092 = vtanh.f32 %v462_v28  ;;  %v948_v32 = vmul.f32 -1.442695, %v462_v28 }
 0x8f6   :  { %v1025_v30 = vpop.f32.mrf.mxu0 }
 0x8f7   :  { %1094 = vpow2.f32 %v948_v32 }
 0x902   :  { %v1093_v31 = vpop.eup %1092 }
 0x903   :  { %475 = vrot.lane.b32.xlu1 %v1093_v31, %s1134_s5 }
 0x904   :  { %v1095_v33 = vpop.eup %1094 }
 0x905   :  { %v466_v34 = vadd.f32 1.0, %v1095_v33 }
 0x907   :  { %1096 = vrcp.f32 %v466_v34 }
 0x914   :  { %v1097_v35 = vpop.eup %1096 }
 0x915   :  { %v473_v40 = vmul.f32 %v1097_v35, %v471_v39 }
 0x975   :  { %v476_v37 = vpop.permute.xlu1 %475 }
 0x976   :  { %v478_v38 = vmul.f32 %v1097_v35, %v476_v37 }
 0x978   :  { %480 = vrot.lane.b32.xlu0 %v478_v38, %s1135_s3 }
 0x9ea   :  { %v481_v41 = vpop.permute.xlu0 %480 }
 0x9eb   :  { %v483_v15 = vadd.f32 %v481_v41, %v473_v40 }
 0x9ed   :  { %1098 = vtanh.f32 %v483_v15  ;;  %v568_v61 = vrot.slane %v483_v15, 6 }
 0x9fa   :  { %v1099_v42 = vpop.eup %1098 }
 0x9fb   :  { %486 = vrot.lane.b32.xlu1 %v1099_v42, %s1134_s5 }
 0xa6d   :  { %v487_v43 = vpop.permute.xlu1 %486 }
 0xa6e   :  { %v489_v44 = vmul.f32 %v1097_v35, %v487_v43 }
 0xa70   :  { %v1288_v45 = vpack.c.bf16 %v489_v44, %v489_v44 }
 0xa72   :  { %v513_v46 = vrot.slane %v1288_v45, 3 }
 0xa74   :  { %514 = vrot.lane.b32.xlu0 %v513_v46, %s1135_s3 }
 0xae6   :  { %v515_v47 = vpop.permute.xlu0 %514 }
 0xae7   :  { %1031 = vmatmul.mubr.msk.bf16.vlgmr.msra.gmra.mxu1 %vm122_vm3, %v515_v47 }
 0xae8   :  { %1043 = vmatpush3.bf16.msra.mxu1 %v1191_v2  ;;  %1046 = vmatprep.mubr.msk.bf16.mxu1 %vm1133_vm0, %v1132_v0 }
 0xae9   :  { %1044 = vmatprep.subr.bf16.mxu1 %v1132_v0 }
 0xaec   :  { %1045 = vmatpush3.bf16.msra.mxu1 %v1204_v4 }
 0xba7   :  { %v553_v48 = vpop.f32.mrf.mxu1 }
 0xba8   :  { %v559_v49 = vadd.f32 %v553_v48, %v1234_v13 }
 0xba9   :  { %v1032_v50 = vpop.f32.mrf.mxu1 }
 0xbaa   :  { %1100 = vtanh.f32 %v559_v49  ;;  %v951_v54 = vmul.f32 -1.442695, %v559_v49 }
 0xbab   :  { %v556_v51 = vpop.f32.mrf.mxu1 }
 0xbac   :  { %1102 = vpow2.f32 %v951_v54 }
 0xbad   :  { %v1033_v52 = vpop.f32.mrf.mxu1 }
 0xbb7   :  { %v1101_v53 = vpop.eup %1100 }
 0xbb8   :  { %572 = vrot.lane.b32.xlu1 %v1101_v53, %s1134_s5 }
 0xbb9   :  { %v1103_v55 = vpop.eup %1102 }
 0xbba   :  { %v563_v56 = vadd.f32 1.0, %v1103_v55 }
 0xbbc   :  { %1104 = vrcp.f32 %v563_v56 }
 0xbc9   :  { %v1105_v57 = vpop.eup %1104 }
 0xbca   :  { %v570_v62 = vmul.f32 %v1105_v57, %v568_v61 }
 0xc2a   :  { %v573_v59 = vpop.permute.xlu1 %572 }
 0xc2b   :  { %v575_v60 = vmul.f32 %v1105_v57, %v573_v59 }
 0xc2d   :  { %577 = vrot.lane.b32.xlu0 %v575_v60, %s1135_s3 }
 0xc9f   :  { %v578_v63 = vpop.permute.xlu0 %577 }
 0xca0   :  { %v580_v1 = vadd.f32 %v578_v63, %v570_v62 }
 0xca2   :  { %1106 = vtanh.f32 %v580_v1 }
 0xcaf   :  { %v1107_v3 = vpop.eup %1106 }
 0xcb0   :  { %583 = vrot.lane.b32.xlu1 %v1107_v3, %s1134_s5 }
 0xd22   :  { %v584_v5 = vpop.permute.xlu1 %583 }
 0xd23   :  { %v586_v6 = vmul.f32 %v1105_v57, %v584_v5 }
 0xd25   :  { %v1302_v7 = vpack.c.bf16 %v586_v6, %v586_v6  ;;  %v1136_v6 = vmov 1966171168  }
 0xd27   :  { %608 = vrot.lane.b32.xlu0 %v1302_v7, %s1135_s3 }
 0xd99   :  { %v609_v8 = vpop.permute.xlu0 %608 }
 0xd9a   :  { %1039 = vmatmul.mubr.msk.bf16.vlgmr.msra.gmra.mxu0 %vm122_vm3, %v609_v8  ;;  %v198_v8 = vunpack.c.l.s4 %v1136_v6 }
 0xd9b   :  { %1051 = vmatpush3.bf16.msra.mxu0 %v1191_v2  ;;  %1054 = vmatprep.mubr.msk.bf16.mxu0 %vm1133_vm0, %v1132_v0 }
 0xd9c   :  { %1052 = vmatprep.subr.bf16.mxu0 %v1132_v0 }
 0xd9f   :  { %1053 = vmatpush3.bf16.msra.mxu0 %v1204_v4  ;;  %v665_v4 = vrot.slane %v580_v1, 6 }
 0xe5a   :  { %v647_v9 = vpop.f32.mrf.mxu0 }
 0xe5b   :  { %v654_v10 = vrot.slane %v647_v9, 6  ;;  %v200_v9 = vlaneseq }
 0xe5c   :  { %v1040_v11 = vpop.f32.mrf.mxu0 }
 0xe5d   :  { %v656_v12 = vadd.f32 %v654_v10, %v1234_v13  ;;  %v199_v10 = vunpack.c.0.s8 %v198_v8  ;;  %v201_v11 = vshrl.u32 %v200_v9, 7 }
 0xe5e   :  { %v650_v14 = vpop.f32.mrf.mxu0 }
 0xe5f   :  { %1108 = vtanh.f32 %v656_v12  ;;  %v954_v18 = vmul.f32 -1.442695, %v656_v12  ;;  %v202_v12 = vsub.s32 %v199_v10, %v201_v11 }
 0xe60   :  { %v1041_v16 = vpop.f32.mrf.mxu0 }
 0xe61   :  { %1110 = vpow2.f32 %v954_v18 }
 0xe6c   :  { %v1109_v17 = vpop.eup %1108 }
 0xe6d   :  { %669 = vrot.lane.b32.xlu1 %v1109_v17, %s1134_s5  ;;  %v399_v17 = vrot.slane %v1273_v22, %v202_v12 }
 0xe6e   :  { %v1111_v2 = vpop.eup %1110 }
 0xe6f   :  { %v660_v19 = vadd.f32 1.0, %v1111_v2 }
 0xe71   :  { %1112 = vrcp.f32 %v660_v19  ;;  %v406_v19 = vrot.slane %v399_v17, %v202_v12 }
 0xe7e   :  { %v1113_v20 = vpop.eup %1112 }
 0xe7f   :  { %v667_v23 = vmul.f32 %v1113_v20, %v665_v4 }
 0xedf   :  { %v670_v0 = vpop.permute.xlu1 %669 }
 0xee0   :  { %v672_v21 = vmul.f32 %v1113_v20, %v670_v0 }
 0xee2   :  { %674 = vrot.lane.b32.xlu0 %v672_v21, %s1135_s3  ;;  %v407_v21 = vcombine.high %v406_v19, %v406_v19 }
 0xf54   :  { %v675_v24 = vpop.permute.xlu0 %674 }
 0xf55   :  { %v677_v25 = vadd.f32 %v675_v24, %v667_v23 }
 0xf57   :  { %1114 = vtanh.f32 %v677_v25  ;;  %v764_v46 = vrot.slane %v677_v25, 6 }
 0xf64   :  { %v1115_v26 = vpop.eup %1114 }
 0xf65   :  { %680 = vrot.lane.b32.xlu1 %v1115_v26, %s1134_s5 }
 0xfd7   :  { %v681_v27 = vpop.permute.xlu1 %680 }
 0xfd8   :  { %v683_v28 = vmul.f32 %v1113_v20, %v681_v27  ;;  %v595_v20 = vrot.slane %v1302_v7, %v202_v12 }
 0xfda   :  { %v1316_v29 = vpack.c.bf16 %v683_v28, %v683_v28  ;;  %v602_v4 = vrot.slane %v595_v20, %v202_v12  ;;  %v300_v28 = vrot.slane %v1258_v58, %v202_v12 }
 0xfdc   :  { %v706_v30 = vrot.slane %v1316_v29, 1  ;;  %v692_v58 = vrot.slane %v1316_v29, %v202_v12 }
 0xfde   :  { %707 = vrot.lane.b32.xlu0 %v706_v30, %s1135_s3  ;;  %v498_v30 = vrot.slane %v1288_v45, %v202_v12 }
0x1050   :  { %v708_v31 = vpop.permute.xlu0 %707 }
0x1051   :  { %1047 = vmatmul.mubr.msk.bf16.vlgmr.msra.gmra.mxu1 %vm122_vm3, %v708_v31 }
0x1111   :  { %v746_v32 = vpop.f32.mrf.mxu1 }
0x1112   :  { %v753_v33 = vrot.slane %v746_v32, 4  ;;  %v301_v32 = vcombine.high %v300_v28, %v300_v28 }
0x1113   :  { %v1048_v34 = vpop.f32.mrf.mxu1 }
0x1114   :  { %v755_v35 = vadd.f32 %v753_v33, %v1234_v13  ;;  %v499_v33 = vcombine.high %v498_v30, %v498_v30  ;;  %v308_v45 = vrot.slane %v301_v32, %v202_v12 }
0x1115   :  { %v749_v37 = vpop.f32.mrf.mxu1 }
0x1116   :  { %1116 = vtanh.f32 %v755_v35  ;;  %v957_v40 = vmul.f32 -1.442695, %v755_v35  ;;  %v506_v37 = vrot.slane %v499_v33, %v202_v12 }
0x1117   :  { %v1049_v38 = vpop.f32.mrf.mxu1 }
0x1118   :  { %1118 = vpow2.f32 %v957_v40  ;;  %v693_v38 = vcombine.high %v692_v58, %v692_v58 }
0x111a   :  { %v700_v40 = vrot.slane %v693_v38, %v202_v12 }
0x1123   :  { %v1117_v39 = vpop.eup %1116 }
0x1124   :  { %768 = vrot.lane.b32.xlu1 %v1117_v39, %s1134_s5  ;;  %v507_v39 = vcombine.high %v506_v37, %v506_v37 }
0x1125   :  { %v1119_v41 = vpop.eup %1118 }
0x1126   :  { %v759_v15 = vadd.f32 1.0, %v1119_v41 }
0x1128   :  { %1120 = vrcp.f32 %v759_v15 }
0x1135   :  { %v1121_v42 = vpop.eup %1120 }
0x1136   :  { %v766_v47 = vmul.f32 %v1121_v42, %v764_v46 }
0x1196   :  { %v769_v43 = vpop.permute.xlu1 %768 }
0x1197   :  { %v771_v44 = vmul.f32 %v1121_v42, %v769_v43 }
0x1199   :  { %773 = vrot.lane.b32.xlu0 %v771_v44, %s1135_s3 }
0x120b   :  { %v774_v48 = vpop.permute.xlu0 %773 }
0x120c   :  { %v776_v49 = vadd.f32 %v774_v48, %v766_v47 }
0x120e   :  { %1122 = vtanh.f32 %v776_v49  ;;  %v863_v22 = vrot.slane %v776_v49, 6 }
0x121b   :  { %v1123_v50 = vpop.eup %1122 }
0x121c   :  { %779 = vrot.lane.b32.xlu1 %v1123_v50, %s1134_s5 }
0x128e   :  { %v780_v51 = vpop.permute.xlu1 %779 }
0x128f   :  { %v782_v52 = vmul.f32 %v1121_v42, %v780_v51 }
0x1291   :  { %v783_v53 = vpack.c.bf16 %v782_v52, %v782_v52 }
0x1293   :  { %v805_v54 = vrot.slane %v783_v53, 2  ;;  %v791_v0 = vrot.slane %v783_v53, %v202_v12 }
0x1295   :  { %806 = vrot.lane.b32.xlu0 %v805_v54, %s1135_s3  ;;  %v798_v23 = vrot.slane %v791_v0, %v202_v12 }
0x1307   :  { %v807_v55 = vpop.permute.xlu0 %806 }
0x1308   :  { %1055 = vmatmul.mubr.msk.bf16.vlgmr.msra.gmra.mxu0 %vm122_vm3, %v807_v55 }
0x13c8   :  { %v845_v56 = vpop.f32.mrf.mxu0 }
0x13c9   :  { %v852_v57 = vrot.slane %v845_v56, 2 }
0x13ca   :  { %v1056_v59 = vpop.f32.mrf.mxu0 }
0x13cb   :  { %v854_v60 = vadd.f32 %v852_v57, %v1234_v13  ;;  %v203_v13 = vrot.slane %v1243_v36, %v202_v12  ;;  %v799_v36 = vcombine.high %v798_v23, %v798_v23 }
0x13cc   :  { %v848_v61 = vpop.f32.mrf.mxu0 }
0x13cd   :  { %1124 = vtanh.f32 %v854_v60  ;;  %v960_v1 = vmul.f32 -1.442695, %v854_v60  ;;  %v210_v2 = vrot.slane %v203_v13, %v202_v12 }
0x13ce   :  { %v1057_v62 = vpop.f32.mrf.mxu0 }
0x13cf   :  { %1126 = vpow2.f32 %v960_v1 }
0x13da   :  { %v1125_v63 = vpop.eup %1124 }
0x13db   :  { %867 = vrot.lane.b32.xlu1 %v1125_v63, %s1134_s5 }
0x13dc   :  { %v1127_v3 = vpop.eup %1126 }
0x13dd   :  { %v858_v5 = vadd.f32 1.0, %v1127_v3 }
0x13df   :  { %1128 = vrcp.f32 %v858_v5 }
0x13ec   :  { %v1129_v14 = vpop.eup %1128 }
0x13ed   :  { %v865_v24 = vmul.f32 %v1129_v14, %v863_v22 }
0x144d   :  { %v868_v16 = vpop.permute.xlu1 %867 }
0x144e   :  { %v870_v18 = vmul.f32 %v1129_v14, %v868_v16 }
0x1450   :  { %872 = vrot.lane.b32.xlu0 %v870_v18, %s1135_s3 }
0x1454   :  { %211 = vrot.lane.b32.xlu0 %v210_v2, %s1135_s3 }
0x1458   :  { %408 = vrot.lane.b32.xlu0 %v407_v21, %s1135_s3 }
0x145c   :  { %603 = vrot.lane.b32.xlu0 %v602_v4, %s1135_s3 }
0x1460   :  { %800 = vrot.lane.b32.xlu0 %v799_v36, %s1135_s3 }
0x14c2   :  { %v873_v25 = vpop.permute.xlu0 %872 }
0x14c3   :  { %v875_v26 = vadd.f32 %v873_v25, %v865_v24 }
0x14c5   :  { %1130 = vtanh.f32 %v875_v26 }
0x14c6   :  { %v212_v27 = vpop.permute.xlu0 %211 }
0x14c7   :  { %215 = vst.msk [vmem:[%s1390_s6] sm:$0x1] %vm214_vm4, %v212_v27 }
0x14ca   :  { %v409_v7 = vpop.permute.xlu0 %408 }
0x14cb   :  { %946 = vst.msk [vmem:[%s1390_s6 + $0x2] sm:$0x1] %vm214_vm4, %v409_v7 }
0x14ce   :  { %v604_v31 = vpop.permute.xlu0 %603 }
0x14cf   :  { %952 = vst.msk [vmem:[%s1390_s6 + $0x4] sm:$0x1] %vm214_vm4, %v604_v31 }
0x14d2   :  { %v1131_v34 = vpop.eup %1130  ;;  %v801_v35 = vpop.permute.xlu0 %800 }
0x14d3   :  { %958 = vst.msk [vmem:[%s1390_s6 + $0x6] sm:$0x1] %vm214_vm4, %v801_v35  ;;  %878 = vrot.lane.b32.xlu1 %v1131_v34, %s1134_s5 }
0x14d7   :  { %309 = vrot.lane.b32.xlu1 %v308_v45, %s1135_s3 }
0x14db   :  { %508 = vrot.lane.b32.xlu1 %v507_v39, %s1135_s3 }
0x14df   :  { %701 = vrot.lane.b32.xlu1 %v700_v40, %s1135_s3 }
0x1545   :  { %v879_v41 = vpop.permute.xlu1 %878 }
0x1546   :  { %v881_v15 = vmul.f32 %v1129_v14, %v879_v41 }
0x1548   :  { %v882_v42 = vpack.c.bf16 %v881_v15, %v881_v15  ;;  %906 = vrot.lane.b32.xlu0 %v881_v15, %s1135_s3 }
0x1549   :  { %v310_v43 = vpop.permute.xlu1 %309 }
0x154a   :  { %v890_v44 = vrot.slane %v882_v42, %v202_v12  ;;  %943 = vst.msk [vmem:[%s1390_s6 + $0x1] sm:$0x1] %vm214_vm4, %v310_v43 }
0x154c   :  { %v891_v29 = vcombine.high %v890_v44, %v890_v44 }
0x154d   :  { %v509_v46 = vpop.permute.xlu1 %508 }
0x154e   :  { %949 = vst.msk [vmem:[%s1390_s6 + $0x3] sm:$0x1] %vm214_vm4, %v509_v46  ;;  %v898_v47 = vrot.slane %v891_v29, %v202_v12 }
0x1550   :  { %v899_v48 = vcombine.high %v898_v47, %v898_v47 }
0x1551   :  { %v702_v49 = vpop.permute.xlu1 %701 }
0x1552   :  { %955 = vst.msk [vmem:[%s1390_s6 + $0x5] sm:$0x1] %vm214_vm4, %v702_v49  ;;  %900 = vrot.lane.b32.xlu1 %v899_v48, %s1135_s3 }
0x1556   :  { %912 = vrot.lane.b32.xlu1 %v875_v26, %s1137_s29 }
0x15ba   :  { %v907_v50 = vpop.permute.xlu0 %906 }
0x15bb   :  { %910 = vst.msk [vmem:[#allocation2 - $0x6] sm:$0xc0] %vm909_vm5, %v907_v50  ;;  %919 = vst.msk [vmem:[%s1391_s7 - $0x6] sm:$0xc0] %vm909_vm5, %v907_v50 }
0x15c4   :  { %v901_v51 = vpop.permute.xlu1 %900 }
0x15c5   :  { %961 = vst.msk [vmem:[%s1390_s6 + $0x7] sm:$0x1] %vm214_vm4, %v901_v51 }
0x15c8   :  { %v913_v52 = vpop.permute.xlu1 %912 }
0x15c9   :  { %915 = vst.msk [vmem:[#allocation3 - $0x6] sm:$0xc0] %vm909_vm5, %v913_v52  ;;  %920 = vst.msk [vmem:[%s1392_s8 - $0x6] sm:$0xc0] %vm909_vm5, %v913_v52 }

</bundles_post_ra>
